<compile_context>
chip_gen: v5e
topology: v5e:2x2
jax: 0.10.0
libtpu: 0.0.40
codegen_flags: <defaults>
</compile_context>

<pallas_src>
import math

import jax
import jax.numpy as jnp
import numpy as np
from jax.experimental import pallas as pl
from jax.experimental.pallas import tpu as pltpu

# ----------------------------- model dims -----------------------------------
B = 2          # batch
S = 8          # target sequence length
SM = 8         # memory sequence length
D_MODEL = 32
D_K = 8
D_V = 8
H = 4
D_FF = 64
EPS = 1e-5     # nn.LayerNorm default eps

HK = H * D_K
HV = H * D_V
SCALE = 1.0 / math.sqrt(D_K)
NEG_INF = -1e9


# ----------------------------- kernel helpers --------------------------------
def _layer_norm(x, gamma, beta):
    # One-pass LN: mean and mean-of-squares (halves cross-lane reductions).
    mu = jnp.mean(x, axis=-1, keepdims=True)
    ms = jnp.mean(x * x, axis=-1, keepdims=True)
    var = ms - mu * mu
    return (x - mu) * jax.lax.rsqrt(var + EPS) * gamma + beta


def _softmax(x):
    m = jnp.max(x, axis=-1, keepdims=True)
    e = jnp.exp(x - m)
    # Exact reciprocal (approx=True would be cheaper on the EUP but loosens
    # numerics beyond the 1e-4 check at these tiny sizes).
    return e * pl.reciprocal(jnp.sum(e, axis=-1, keepdims=True), approx=False)


def _attend(q_all, k_all, v_all, bias_ref, bb, sq, sk):
    """Scaled dot-product attention over H heads for a batch chunk.

    q_all: (bb*sq, H*D_K), k_all: (bb*sk, H*D_K), v_all: (bb*sk, H*D_V).
    bias_ref: additive mask ref, block (bb, sq|1, sk) with 0 / -1e9 entries.
    Returns per-head contexts concatenated head-major: (bb*sq, H*D_V).
    """
    rows = []
    for b in range(bb):                      # static, tiny
        bias = bias_ref[b]                   # (sq, sk) or (1, sk) additive
        heads = []
        for h in range(H):                   # static, tiny
            qh = q_all[b * sq:(b + 1) * sq, h * D_K:(h + 1) * D_K]
            kh = k_all[b * sk:(b + 1) * sk, h * D_K:(h + 1) * D_K]
            vh = v_all[b * sk:(b + 1) * sk, h * D_V:(h + 1) * D_V]
            s = jax.lax.dot_general(qh, kh, (((1,), (1,)), ((), ())),
                                    preferred_element_type=jnp.float32)
            p = _softmax(s * SCALE + bias)
            heads.append(jnp.dot(p, vh, preferred_element_type=jnp.float32))
        rows.append(jnp.concatenate(heads, axis=-1))
    return rows[0] if bb == 1 else jnp.concatenate(rows, axis=0)


# ----------------------------- the kernel ------------------------------------
def decoder_layer_kernel(
    # activations / additive attention biases (one batch chunk each)
    tgt_ref, mem_ref, tbias_ref, mbias_ref,
    # masked self-attention (fused QKV + fused output projection)
    wqkv1_ref, bqkv1_ref, wo1_ref, bo1_ref,
    # cross (memory) attention (Q + fused KV + fused output projection)
    wq2_ref, bq2_ref, wkv2_ref, bkv2_ref, wo2_ref, bo2_ref,
    # packed LayerNorm params: rows = (g1, b1, g2, b2, g4, b4)
    ln_ref,
    # position-wise FFN
    wf1_ref, bf1_ref, wf2_ref, bf2_ref,
    # output
    out_ref,
):
    bb, s, d = tgt_ref.shape
    sm = mem_ref.shape[1]

    x = tgt_ref[...].reshape(bb * s, d)        # (bb*S, D)
    mem = mem_ref[...].reshape(bb * sm, d)     # (bb*SM, D)

    # 1) masked multi-head self-attention + residual + LayerNorm
    qkv = jnp.dot(x, wqkv1_ref[...],
                  preferred_element_type=jnp.float32) + bqkv1_ref[...]
    ctx = _attend(qkv[:, :HK], qkv[:, HK:2 * HK], qkv[:, 2 * HK:2 * HK + HV],
                  tbias_ref, bb, s, s)
    sa = jnp.dot(ctx, wo1_ref[...],
                 preferred_element_type=jnp.float32) + bo1_ref[...]
    x = _layer_norm(x + sa, ln_ref[0:1, :], ln_ref[1:2, :])

    # 2) multi-head cross-attention over encoder memory + residual + LayerNorm
    q2 = jnp.dot(x, wq2_ref[...],
                 preferred_element_type=jnp.float32) + bq2_ref[...]
    kv2 = jnp.dot(mem, wkv2_ref[...],
                  preferred_element_type=jnp.float32) + bkv2_ref[...]
    ctx2 = _attend(q2, kv2[:, :HK], kv2[:, HK:HK + HV], mbias_ref, bb, s, sm)
    ca = jnp.dot(ctx2, wo2_ref[...],
                 preferred_element_type=jnp.float32) + bo2_ref[...]
    x = _layer_norm(x + ca, ln_ref[2:3, :], ln_ref[3:4, :])

    # TODO(synk): `spatial` / `add_memory` branches are disabled by the
    # module's default flags; dropout is identity (eval mode).

    # 3) position-wise FFN (Linear -> ReLU -> Linear) + residual + LayerNorm
    h1 = jnp.maximum(
        jnp.dot(x, wf1_ref[...], preferred_element_type=jnp.float32)
        + bf1_ref[...], 0.0)
    ff = jnp.dot(h1, wf2_ref[...],
                 preferred_element_type=jnp.float32) + bf2_ref[...]
    x = _layer_norm(x + ff, ln_ref[4:5, :], ln_ref[5:6, :])

    out_ref[...] = x.reshape(bb, s, d)


# ----------------------------- wrapper ---------------------------------------
def _batch_grid_size(batch):
    """grid=(B,) (parallel) on multi-TensorCore chips (v7x) so batch elements
    shard across cores; single invocation on 1-TC chips (v5e/v6e) to avoid
    per-grid-step pipeline overhead."""
    try:
        kind = jax.devices()[0].device_kind.lower()
        multi_tc = ("v7" in kind) or ("7x" in kind)
    except Exception:
        multi_tc = False
    return batch if multi_tc else 1


def decoder_layer(tgt, memory, tgt_mask, memory_mask, weights):
    b, s, d = tgt.shape
    sm = memory.shape[1]

    nb = _batch_grid_size(b)
    if b % nb != 0:
        nb = 1
    bb = b // nb

    # Hoist mask handling out of the kernel: additive 0 / -1e9 bias.
    tbias = jnp.where(tgt_mask == 0.0, NEG_INF, 0.0).astype(jnp.float32)
    mbias = jnp.where(memory_mask == 0.0, NEG_INF, 0.0).astype(jnp.float32)

    in_specs = [
        pl.BlockSpec((bb, s, d), lambda i: (i, 0, 0)),       # tgt
        pl.BlockSpec((bb, sm, d), lambda i: (i, 0, 0)),      # memory
        pl.BlockSpec((bb, s, s), lambda i: (i, 0, 0)),       # tbias
        pl.BlockSpec((bb, 1, sm), lambda i: (i, 0, 0)),      # mbias
    ] + [pl.BlockSpec(w.shape, lambda i, nd=w.ndim: (0,) * nd) for w in weights]

    return pl.pallas_call(
        decoder_layer_kernel,
        out_shape=jax.ShapeDtypeStruct((b, s, d), jnp.float32),
        grid=(nb,),
        in_specs=in_specs,
        out_specs=pl.BlockSpec((bb, s, d), lambda i: (i, 0, 0)),
        compiler_params=pltpu.CompilerParams(dimension_semantics=("parallel",)),
    )(tgt, memory, tbias, mbias, *weights)


# ----------------------------- pure-JAX reference ----------------------------
def reference(tgt, memory, tmask, mmask, per_head):
    (wq1, bq1, wk1, bk1, wv1, bv1, wo1, bo1,
     wq2, bq2, wk2, bk2, wv2, bv2, wo2, bo2,
     g1, be1, g2, be2, g4, be4,
     wf1, bf1, wf2, bf2) = per_head

    def ln(x, g, b):
        mu = x.mean(-1, keepdims=True)
        var = ((x - mu) ** 2).mean(-1, keepdims=True)
        return (x - mu) / jnp.sqrt(var + EPS) * g + b

    def mha(q_in, k_in, v_in, mask, wq, bq, wk, bk, wv, bv, wo, bo):
        q = jnp.einsum('bsd,hdk->bhsk', q_in, wq) + bq[None]
        k = jnp.einsum('bsd,hdk->bhsk', k_in, wk) + bk[None]
        v = jnp.einsum('bsd,hdv->bhsv', v_in, wv) + bv[None]
        scores = jnp.einsum('bhqk,bhsk->bhqs', q, k) / math.sqrt(D_K)
        scores = jnp.where(mask[:, None] == 0.0, NEG_INF, scores)
        attn = jax.nn.softmax(scores, axis=-1)
        ctx = jnp.einsum('bhqs,bhsv->bhqv', attn, v)
        return jnp.einsum('bhqv,hvd->bqd', ctx, wo) + bo[None]

    x = ln(tgt + mha(tgt, tgt, tgt, tmask,
                     wq1, bq1, wk1, bk1, wv1, bv1, wo1, bo1), g1, be1)
    x = ln(x + mha(x, memory, memory, mmask,
                   wq2, bq2, wk2, bk2, wv2, bv2, wo2, bo2), g2, be2)
    h1 = jnp.maximum(x @ wf1 + bf1, 0.0)
    x = ln(x + (h1 @ wf2 + bf2), g4, be4)
    return x


# ----------------------------- weight packing --------------------------------
def _pack_in(w):        # (H, D, K) -> (D, H*K), head-major along columns
    return jnp.transpose(w, (1, 0, 2)).reshape(w.shape[1], -1)


def _pack_bias(b):      # (H, 1, K) -> (1, H*K)
    return b.reshape(1, -1)


def _pack_out(w):       # (H, V, D) -> (H*V, D), head-major along rows
    return w.reshape(-1, w.shape[2])


# ----------------------------- main ------------------------------------------
if __name__ == "__main__":
    key = jax.random.PRNGKey(0)
    keys = iter(jax.random.split(key, 64))

    def wmat(shape, scale=0.05):
        return (scale * jax.random.normal(next(keys), shape)).astype(jnp.float32)

    # per-head parameters (same layout as the PyTorch module's heads)
    wq1, bq1 = wmat((H, D_MODEL, D_K)), wmat((H, 1, D_K))
    wk1, bk1 = wmat((H, D_MODEL, D_K)), wmat((H, 1, D_K))
    wv1, bv1 = wmat((H, D_MODEL, D_V)), wmat((H, 1, D_V))
    wo1, bo1 = wmat((H, D_V, D_MODEL)), wmat((1, D_MODEL))
    wq2, bq2 = wmat((H, D_MODEL, D_K)), wmat((H, 1, D_K))
    wk2, bk2 = wmat((H, D_MODEL, D_K)), wmat((H, 1, D_K))
    wv2, bv2 = wmat((H, D_MODEL, D_V)), wmat((H, 1, D_V))
    wo2, bo2 = wmat((H, D_V, D_MODEL)), wmat((1, D_MODEL))
    g1, be1 = 1.0 + wmat((1, D_MODEL)), wmat((1, D_MODEL))
    g2, be2 = 1.0 + wmat((1, D_MODEL)), wmat((1, D_MODEL))
    g4, be4 = 1.0 + wmat((1, D_MODEL)), wmat((1, D_MODEL))
    wf1, bf1 = wmat((D_MODEL, D_FF)), wmat((1, D_FF))
    wf2, bf2 = wmat((D_FF, D_MODEL)), wmat((1, D_MODEL))

    per_head = [wq1, bq1, wk1, bk1, wv1, bv1, wo1, bo1,
                wq2, bq2, wk2, bk2, wv2, bv2, wo2, bo2,
                g1, be1, g2, be2, g4, be4,
                wf1, bf1, wf2, bf2]

    # packed slabs for the kernel
    wqkv1 = jnp.concatenate([_pack_in(wq1), _pack_in(wk1), _pack_in(wv1)], axis=1)
    bqkv1 = jnp.concatenate([_pack_bias(bq1), _pack_bias(bk1), _pack_bias(bv1)],
                            axis=1)
    wkv2 = jnp.concatenate([_pack_in(wk2), _pack_in(wv2)], axis=1)
    bkv2 = jnp.concatenate([_pack_bias(bk2), _pack_bias(bv2)], axis=1)
    ln_pack = jnp.concatenate([g1, be1, g2, be2, g4, be4], axis=0)  # (6, D)

    packed = [
        wqkv1, bqkv1, _pack_out(wo1), bo1,
        _pack_in(wq2), _pack_bias(bq2), wkv2, bkv2, _pack_out(wo2), bo2,
        ln_pack,
        wf1, bf1, wf2, bf2,
    ]

    tgt = jax.random.normal(next(keys), (B, S, D_MODEL), jnp.float32)
    memory = jax.random.normal(next(keys), (B, SM, D_MODEL), jnp.float32)
    # causal "subsequent" mask for the target, all-ones mask for memory
    tgt_mask = jnp.broadcast_to(jnp.tril(jnp.ones((S, S), jnp.float32)), (B, S, S))
    memory_mask = jnp.ones((B, 1, SM), jnp.float32)

    out = decoder_layer(tgt, memory, tgt_mask, memory_mask, packed)
    out = jax.block_until_ready(out)

    ref = reference(tgt, memory, tgt_mask, memory_mask, per_head)
    np.testing.assert_allclose(np.asarray(out), np.asarray(ref),
                               rtol=1e-4, atol=1e-4)

    print("KERNEL_OK")
</pallas_src>

<mosaic_0001>
module attributes {stable_mosaic.version = 11 : i64} {
  func.func @decoder_layer_kernel(%arg0: i32, %arg1: memref<2x8x32xf32, #tpu.memory_space<vmem>>, %arg2: memref<2x8x32xf32, #tpu.memory_space<vmem>>, %arg3: memref<2x8x8xf32, #tpu.memory_space<vmem>>, %arg4: memref<2x1x8xf32, #tpu.memory_space<vmem>>, %arg5: memref<32x96xf32, #tpu.memory_space<vmem>>, %arg6: memref<1x96xf32, #tpu.memory_space<vmem>>, %arg7: memref<32x32xf32, #tpu.memory_space<vmem>>, %arg8: memref<1x32xf32, #tpu.memory_space<vmem>>, %arg9: memref<32x32xf32, #tpu.memory_space<vmem>>, %arg10: memref<1x32xf32, #tpu.memory_space<vmem>>, %arg11: memref<32x64xf32, #tpu.memory_space<vmem>>, %arg12: memref<1x64xf32, #tpu.memory_space<vmem>>, %arg13: memref<32x32xf32, #tpu.memory_space<vmem>>, %arg14: memref<1x32xf32, #tpu.memory_space<vmem>>, %arg15: memref<6x32xf32, #tpu.memory_space<vmem>>, %arg16: memref<32x64xf32, #tpu.memory_space<vmem>>, %arg17: memref<1x64xf32, #tpu.memory_space<vmem>>, %arg18: memref<64x32xf32, #tpu.memory_space<vmem>>, %arg19: memref<1x32xf32, #tpu.memory_space<vmem>>, %arg20: memref<2x8x32xf32, #tpu.memory_space<vmem>>) attributes {dimension_semantics = [#tpu.dimension_semantics<parallel>], iteration_bounds = array<i64: 1>, scalar_prefetch = 0 : i64, scratch_operands = 0 : i64, tpu.core_type = #tpu.core_type<tc>, window_params = [{transform_indices = @transform_0, window_bounds = array<i64: 2, 8, 32>}, {transform_indices = @transform_1, window_bounds = array<i64: 2, 8, 32>}, {transform_indices = @transform_2, window_bounds = array<i64: 2, 8, 8>}, {transform_indices = @transform_3, window_bounds = array<i64: 2, 1, 8>}, {pipeline_mode = #tpu.pipeline_mode<synchronous>, transform_indices = @transform_4, window_bounds = array<i64: 32, 96>}, {pipeline_mode = #tpu.pipeline_mode<synchronous>, transform_indices = @transform_5, window_bounds = array<i64: 1, 96>}, {pipeline_mode = #tpu.pipeline_mode<synchronous>, transform_indices = @transform_6, window_bounds = array<i64: 32, 32>}, {pipeline_mode = #tpu.pipeline_mode<synchronous>, transform_indices = @transform_7, window_bounds = array<i64: 1, 32>}, {pipeline_mode = #tpu.pipeline_mode<synchronous>, transform_indices = @transform_8, window_bounds = array<i64: 32, 32>}, {pipeline_mode = #tpu.pipeline_mode<synchronous>, transform_indices = @transform_9, window_bounds = array<i64: 1, 32>}, {pipeline_mode = #tpu.pipeline_mode<synchronous>, transform_indices = @transform_10, window_bounds = array<i64: 32, 64>}, {pipeline_mode = #tpu.pipeline_mode<synchronous>, transform_indices = @transform_11, window_bounds = array<i64: 1, 64>}, {pipeline_mode = #tpu.pipeline_mode<synchronous>, transform_indices = @transform_12, window_bounds = array<i64: 32, 32>}, {pipeline_mode = #tpu.pipeline_mode<synchronous>, transform_indices = @transform_13, window_bounds = array<i64: 1, 32>}, {pipeline_mode = #tpu.pipeline_mode<synchronous>, transform_indices = @transform_14, window_bounds = array<i64: 6, 32>}, {pipeline_mode = #tpu.pipeline_mode<synchronous>, transform_indices = @transform_15, window_bounds = array<i64: 32, 64>}, {pipeline_mode = #tpu.pipeline_mode<synchronous>, transform_indices = @transform_16, window_bounds = array<i64: 1, 64>}, {pipeline_mode = #tpu.pipeline_mode<synchronous>, transform_indices = @transform_17, window_bounds = array<i64: 64, 32>}, {pipeline_mode = #tpu.pipeline_mode<synchronous>, transform_indices = @transform_18, window_bounds = array<i64: 1, 32>}, {transform_indices = @transform_19, window_bounds = array<i64: 2, 8, 32>}]} {
    %c0 = arith.constant 0 : index
    %c0_0 = arith.constant 0 : index
    %c0_1 = arith.constant 0 : index
    %0 = vector.load %arg1[%c0, %c0_0, %c0_1] : memref<2x8x32xf32, #tpu.memory_space<vmem>>, vector<2x8x32xf32>
    %1 = vector.shape_cast %0 : vector<2x8x32xf32> to vector<16x32xf32>
    %c0_2 = arith.constant 0 : index
    %c0_3 = arith.constant 0 : index
    %c0_4 = arith.constant 0 : index
    %2 = vector.load %arg2[%c0_2, %c0_3, %c0_4] : memref<2x8x32xf32, #tpu.memory_space<vmem>>, vector<2x8x32xf32>
    %3 = vector.shape_cast %2 : vector<2x8x32xf32> to vector<16x32xf32>
    %c0_5 = arith.constant 0 : index
    %c0_6 = arith.constant 0 : index
    %4 = vector.load %arg5[%c0_5, %c0_6] : memref<32x96xf32, #tpu.memory_space<vmem>>, vector<32x96xf32>
    %cst = arith.constant dense<0.000000e+00> : vector<16x96xf32>
    %5 = tpu.matmul %1, %4, %cst {dimension_numbers = #tpu.dot_dimension_numbers<[1], [0], [0], [1], [0, 0, 1, 1], [], []>} : vector<16x32xf32>, vector<32x96xf32>, vector<16x96xf32> -> vector<16x96xf32>
    %c0_7 = arith.constant 0 : index
    %c0_8 = arith.constant 0 : index
    %6 = vector.load %arg6[%c0_7, %c0_8] : memref<1x96xf32, #tpu.memory_space<vmem>>, vector<1x96xf32>
    %7 = vector.broadcast %6 : vector<1x96xf32> to vector<16x96xf32>
    %8 = arith.addf %5, %7 : vector<16x96xf32>
    %9 = vector.extract_strided_slice %8 {offsets = [0, 0], sizes = [16, 32], strides = [1, 1]} : vector<16x96xf32> to vector<16x32xf32>
    %10 = vector.extract_strided_slice %8 {offsets = [0, 32], sizes = [16, 32], strides = [1, 1]} : vector<16x96xf32> to vector<16x32xf32>
    %11 = vector.extract_strided_slice %8 {offsets = [0, 64], sizes = [16, 32], strides = [1, 1]} : vector<16x96xf32> to vector<16x32xf32>
    %c0_9 = arith.constant 0 : index
    %c0_10 = arith.constant 0 : index
    %c0_11 = arith.constant 0 : index
    %12 = vector.load %arg3[%c0_9, %c0_10, %c0_11] : memref<2x8x8xf32, #tpu.memory_space<vmem>>, vector<1x8x8xf32>
    %13 = vector.shape_cast %12 : vector<1x8x8xf32> to vector<8x8xf32>
    %14 = vector.extract_strided_slice %9 {offsets = [0, 0], sizes = [8, 8], strides = [1, 1]} : vector<16x32xf32> to vector<8x8xf32>
    %15 = vector.extract_strided_slice %10 {offsets = [0, 0], sizes = [8, 8], strides = [1, 1]} : vector<16x32xf32> to vector<8x8xf32>
    %16 = vector.extract_strided_slice %11 {offsets = [0, 0], sizes = [8, 8], strides = [1, 1]} : vector<16x32xf32> to vector<8x8xf32>
    %cst_12 = arith.constant dense<0.000000e+00> : vector<8x8xf32>
    %17 = tpu.matmul %14, %15, %cst_12 {dimension_numbers = #tpu.dot_dimension_numbers<[1], [1], [0], [0], [0, 0, 1, 0], [], []>} : vector<8x8xf32>, vector<8x8xf32>, vector<8x8xf32> -> vector<8x8xf32>
    %cst_13 = arith.constant 0.353553385 : f32
    %18 = vector.broadcast %cst_13 : f32 to vector<8x8xf32>
    %19 = arith.mulf %17, %18 : vector<8x8xf32>
    %20 = arith.addf %19, %13 : vector<8x8xf32>
    %cst_14 = arith.constant dense<0xFF800000> : vector<8xf32>
    %21 = vector.multi_reduction <maximumf>, %20, %cst_14 [1] : vector<8x8xf32> to vector<8xf32>
    %22 = vector.shape_cast %21 : vector<8xf32> to vector<8x1xf32>
    %23 = vector.broadcast %22 : vector<8x1xf32> to vector<8x8xf32>
    %24 = arith.subf %20, %23 : vector<8x8xf32>
    %25 = math.exp %24 : vector<8x8xf32>
    %cst_15 = arith.constant dense<0.000000e+00> : vector<8xf32>
    %26 = vector.multi_reduction <add>, %25, %cst_15 [1] : vector<8x8xf32> to vector<8xf32>
    %27 = vector.shape_cast %26 : vector<8xf32> to vector<8x1xf32>
    %28 = tpu.reciprocal %27 : vector<8x1xf32> -> vector<8x1xf32>
    %29 = vector.broadcast %28 : vector<8x1xf32> to vector<8x8xf32>
    %30 = arith.mulf %25, %29 : vector<8x8xf32>
    %cst_16 = arith.constant dense<0.000000e+00> : vector<8x8xf32>
    %31 = tpu.matmul %30, %16, %cst_16 {dimension_numbers = #tpu.dot_dimension_numbers<[1], [0], [0], [1], [0, 0, 1, 1], [], []>} : vector<8x8xf32>, vector<8x8xf32>, vector<8x8xf32> -> vector<8x8xf32>
    %32 = vector.extract_strided_slice %9 {offsets = [0, 8], sizes = [8, 8], strides = [1, 1]} : vector<16x32xf32> to vector<8x8xf32>
    %33 = vector.extract_strided_slice %10 {offsets = [0, 8], sizes = [8, 8], strides = [1, 1]} : vector<16x32xf32> to vector<8x8xf32>
    %34 = vector.extract_strided_slice %11 {offsets = [0, 8], sizes = [8, 8], strides = [1, 1]} : vector<16x32xf32> to vector<8x8xf32>
    %cst_17 = arith.constant dense<0.000000e+00> : vector<8x8xf32>
    %35 = tpu.matmul %32, %33, %cst_17 {dimension_numbers = #tpu.dot_dimension_numbers<[1], [1], [0], [0], [0, 0, 1, 0], [], []>} : vector<8x8xf32>, vector<8x8xf32>, vector<8x8xf32> -> vector<8x8xf32>
    %cst_18 = arith.constant 0.353553385 : f32
    %36 = vector.broadcast %cst_18 : f32 to vector<8x8xf32>
    %37 = arith.mulf %35, %36 : vector<8x8xf32>
    %38 = arith.addf %37, %13 : vector<8x8xf32>
    %cst_19 = arith.constant dense<0xFF800000> : vector<8xf32>
    %39 = vector.multi_reduction <maximumf>, %38, %cst_19 [1] : vector<8x8xf32> to vector<8xf32>
    %40 = vector.shape_cast %39 : vector<8xf32> to vector<8x1xf32>
    %41 = vector.broadcast %40 : vector<8x1xf32> to vector<8x8xf32>
    %42 = arith.subf %38, %41 : vector<8x8xf32>
    %43 = math.exp %42 : vector<8x8xf32>
    %cst_20 = arith.constant dense<0.000000e+00> : vector<8xf32>
    %44 = vector.multi_reduction <add>, %43, %cst_20 [1] : vector<8x8xf32> to vector<8xf32>
    %45 = vector.shape_cast %44 : vector<8xf32> to vector<8x1xf32>
    %46 = tpu.reciprocal %45 : vector<8x1xf32> -> vector<8x1xf32>
    %47 = vector.broadcast %46 : vector<8x1xf32> to vector<8x8xf32>
    %48 = arith.mulf %43, %47 : vector<8x8xf32>
    %cst_21 = arith.constant dense<0.000000e+00> : vector<8x8xf32>
    %49 = tpu.matmul %48, %34, %cst_21 {dimension_numbers = #tpu.dot_dimension_numbers<[1], [0], [0], [1], [0, 0, 1, 1], [], []>} : vector<8x8xf32>, vector<8x8xf32>, vector<8x8xf32> -> vector<8x8xf32>
    %50 = vector.extract_strided_slice %9 {offsets = [0, 16], sizes = [8, 8], strides = [1, 1]} : vector<16x32xf32> to vector<8x8xf32>
    %51 = vector.extract_strided_slice %10 {offsets = [0, 16], sizes = [8, 8], strides = [1, 1]} : vector<16x32xf32> to vector<8x8xf32>
    %52 = vector.extract_strided_slice %11 {offsets = [0, 16], sizes = [8, 8], strides = [1, 1]} : vector<16x32xf32> to vector<8x8xf32>
    %cst_22 = arith.constant dense<0.000000e+00> : vector<8x8xf32>
    %53 = tpu.matmul %50, %51, %cst_22 {dimension_numbers = #tpu.dot_dimension_numbers<[1], [1], [0], [0], [0, 0, 1, 0], [], []>} : vector<8x8xf32>, vector<8x8xf32>, vector<8x8xf32> -> vector<8x8xf32>
    %cst_23 = arith.constant 0.353553385 : f32
    %54 = vector.broadcast %cst_23 : f32 to vector<8x8xf32>
    %55 = arith.mulf %53, %54 : vector<8x8xf32>
    %56 = arith.addf %55, %13 : vector<8x8xf32>
    %cst_24 = arith.constant dense<0xFF800000> : vector<8xf32>
    %57 = vector.multi_reduction <maximumf>, %56, %cst_24 [1] : vector<8x8xf32> to vector<8xf32>
    %58 = vector.shape_cast %57 : vector<8xf32> to vector<8x1xf32>
    %59 = vector.broadcast %58 : vector<8x1xf32> to vector<8x8xf32>
    %60 = arith.subf %56, %59 : vector<8x8xf32>
    %61 = math.exp %60 : vector<8x8xf32>
    %cst_25 = arith.constant dense<0.000000e+00> : vector<8xf32>
    %62 = vector.multi_reduction <add>, %61, %cst_25 [1] : vector<8x8xf32> to vector<8xf32>
    %63 = vector.shape_cast %62 : vector<8xf32> to vector<8x1xf32>
    %64 = tpu.reciprocal %63 : vector<8x1xf32> -> vector<8x1xf32>
    %65 = vector.broadcast %64 : vector<8x1xf32> to vector<8x8xf32>
    %66 = arith.mulf %61, %65 : vector<8x8xf32>
    %cst_26 = arith.constant dense<0.000000e+00> : vector<8x8xf32>
    %67 = tpu.matmul %66, %52, %cst_26 {dimension_numbers = #tpu.dot_dimension_numbers<[1], [0], [0], [1], [0, 0, 1, 1], [], []>} : vector<8x8xf32>, vector<8x8xf32>, vector<8x8xf32> -> vector<8x8xf32>
    %68 = vector.extract_strided_slice %9 {offsets = [0, 24], sizes = [8, 8], strides = [1, 1]} : vector<16x32xf32> to vector<8x8xf32>
    %69 = vector.extract_strided_slice %10 {offsets = [0, 24], sizes = [8, 8], strides = [1, 1]} : vector<16x32xf32> to vector<8x8xf32>
    %70 = vector.extract_strided_slice %11 {offsets = [0, 24], sizes = [8, 8], strides = [1, 1]} : vector<16x32xf32> to vector<8x8xf32>
    %cst_27 = arith.constant dense<0.000000e+00> : vector<8x8xf32>
    %71 = tpu.matmul %68, %69, %cst_27 {dimension_numbers = #tpu.dot_dimension_numbers<[1], [1], [0], [0], [0, 0, 1, 0], [], []>} : vector<8x8xf32>, vector<8x8xf32>, vector<8x8xf32> -> vector<8x8xf32>
    %cst_28 = arith.constant 0.353553385 : f32
    %72 = vector.broadcast %cst_28 : f32 to vector<8x8xf32>
    %73 = arith.mulf %71, %72 : vector<8x8xf32>
    %74 = arith.addf %73, %13 : vector<8x8xf32>
    %cst_29 = arith.constant dense<0xFF800000> : vector<8xf32>
    %75 = vector.multi_reduction <maximumf>, %74, %cst_29 [1] : vector<8x8xf32> to vector<8xf32>
    %76 = vector.shape_cast %75 : vector<8xf32> to vector<8x1xf32>
    %77 = vector.broadcast %76 : vector<8x1xf32> to vector<8x8xf32>
    %78 = arith.subf %74, %77 : vector<8x8xf32>
    %79 = math.exp %78 : vector<8x8xf32>
    %cst_30 = arith.constant dense<0.000000e+00> : vector<8xf32>
    %80 = vector.multi_reduction <add>, %79, %cst_30 [1] : vector<8x8xf32> to vector<8xf32>
    %81 = vector.shape_cast %80 : vector<8xf32> to vector<8x1xf32>
    %82 = tpu.reciprocal %81 : vector<8x1xf32> -> vector<8x1xf32>
    %83 = vector.broadcast %82 : vector<8x1xf32> to vector<8x8xf32>
    %84 = arith.mulf %79, %83 : vector<8x8xf32>
    %cst_31 = arith.constant dense<0.000000e+00> : vector<8x8xf32>
    %85 = tpu.matmul %84, %70, %cst_31 {dimension_numbers = #tpu.dot_dimension_numbers<[1], [0], [0], [1], [0, 0, 1, 1], [], []>} : vector<8x8xf32>, vector<8x8xf32>, vector<8x8xf32> -> vector<8x8xf32>
    %86 = tpu.concatenate %31, %49, %67, %85 in 1 : vector<8x8xf32>, vector<8x8xf32>, vector<8x8xf32>, vector<8x8xf32> -> vector<8x32xf32>
    %c1 = arith.constant 1 : index
    %c0_32 = arith.constant 0 : index
    %c0_33 = arith.constant 0 : index
    %87 = vector.load %arg3[%c1, %c0_32, %c0_33] : memref<2x8x8xf32, #tpu.memory_space<vmem>>, vector<1x8x8xf32>
    %88 = vector.shape_cast %87 : vector<1x8x8xf32> to vector<8x8xf32>
    %89 = vector.extract_strided_slice %9 {offsets = [8, 0], sizes = [8, 8], strides = [1, 1]} : vector<16x32xf32> to vector<8x8xf32>
    %90 = vector.extract_strided_slice %10 {offsets = [8, 0], sizes = [8, 8], strides = [1, 1]} : vector<16x32xf32> to vector<8x8xf32>
    %91 = vector.extract_strided_slice %11 {offsets = [8, 0], sizes = [8, 8], strides = [1, 1]} : vector<16x32xf32> to vector<8x8xf32>
    %cst_34 = arith.constant dense<0.000000e+00> : vector<8x8xf32>
    %92 = tpu.matmul %89, %90, %cst_34 {dimension_numbers = #tpu.dot_dimension_numbers<[1], [1], [0], [0], [0, 0, 1, 0], [], []>} : vector<8x8xf32>, vector<8x8xf32>, vector<8x8xf32> -> vector<8x8xf32>
    %cst_35 = arith.constant 0.353553385 : f32
    %93 = vector.broadcast %cst_35 : f32 to vector<8x8xf32>
    %94 = arith.mulf %92, %93 : vector<8x8xf32>
    %95 = arith.addf %94, %88 : vector<8x8xf32>
    %cst_36 = arith.constant dense<0xFF800000> : vector<8xf32>
    %96 = vector.multi_reduction <maximumf>, %95, %cst_36 [1] : vector<8x8xf32> to vector<8xf32>
    %97 = vector.shape_cast %96 : vector<8xf32> to vector<8x1xf32>
    %98 = vector.broadcast %97 : vector<8x1xf32> to vector<8x8xf32>
    %99 = arith.subf %95, %98 : vector<8x8xf32>
    %100 = math.exp %99 : vector<8x8xf32>
    %cst_37 = arith.constant dense<0.000000e+00> : vector<8xf32>
    %101 = vector.multi_reduction <add>, %100, %cst_37 [1] : vector<8x8xf32> to vector<8xf32>
    %102 = vector.shape_cast %101 : vector<8xf32> to vector<8x1xf32>
    %103 = tpu.reciprocal %102 : vector<8x1xf32> -> vector<8x1xf32>
    %104 = vector.broadcast %103 : vector<8x1xf32> to vector<8x8xf32>
    %105 = arith.mulf %100, %104 : vector<8x8xf32>
    %cst_38 = arith.constant dense<0.000000e+00> : vector<8x8xf32>
    %106 = tpu.matmul %105, %91, %cst_38 {dimension_numbers = #tpu.dot_dimension_numbers<[1], [0], [0], [1], [0, 0, 1, 1], [], []>} : vector<8x8xf32>, vector<8x8xf32>, vector<8x8xf32> -> vector<8x8xf32>
    %107 = vector.extract_strided_slice %9 {offsets = [8, 8], sizes = [8, 8], strides = [1, 1]} : vector<16x32xf32> to vector<8x8xf32>
    %108 = vector.extract_strided_slice %10 {offsets = [8, 8], sizes = [8, 8], strides = [1, 1]} : vector<16x32xf32> to vector<8x8xf32>
    %109 = vector.extract_strided_slice %11 {offsets = [8, 8], sizes = [8, 8], strides = [1, 1]} : vector<16x32xf32> to vector<8x8xf32>
    %cst_39 = arith.constant dense<0.000000e+00> : vector<8x8xf32>
    %110 = tpu.matmul %107, %108, %cst_39 {dimension_numbers = #tpu.dot_dimension_numbers<[1], [1], [0], [0], [0, 0, 1, 0], [], []>} : vector<8x8xf32>, vector<8x8xf32>, vector<8x8xf32> -> vector<8x8xf32>
    %cst_40 = arith.constant 0.353553385 : f32
    %111 = vector.broadcast %cst_40 : f32 to vector<8x8xf32>
    %112 = arith.mulf %110, %111 : vector<8x8xf32>
    %113 = arith.addf %112, %88 : vector<8x8xf32>
    %cst_41 = arith.constant dense<0xFF800000> : vector<8xf32>
    %114 = vector.multi_reduction <maximumf>, %113, %cst_41 [1] : vector<8x8xf32> to vector<8xf32>
    %115 = vector.shape_cast %114 : vector<8xf32> to vector<8x1xf32>
    %116 = vector.broadcast %115 : vector<8x1xf32> to vector<8x8xf32>
    %117 = arith.subf %113, %116 : vector<8x8xf32>
    %118 = math.exp %117 : vector<8x8xf32>
    %cst_42 = arith.constant dense<0.000000e+00> : vector<8xf32>
    %119 = vector.multi_reduction <add>, %118, %cst_42 [1] : vector<8x8xf32> to vector<8xf32>
    %120 = vector.shape_cast %119 : vector<8xf32> to vector<8x1xf32>
    %121 = tpu.reciprocal %120 : vector<8x1xf32> -> vector<8x1xf32>
    %122 = vector.broadcast %121 : vector<8x1xf32> to vector<8x8xf32>
    %123 = arith.mulf %118, %122 : vector<8x8xf32>
    %cst_43 = arith.constant dense<0.000000e+00> : vector<8x8xf32>
    %124 = tpu.matmul %123, %109, %cst_43 {dimension_numbers = #tpu.dot_dimension_numbers<[1], [0], [0], [1], [0, 0, 1, 1], [], []>} : vector<8x8xf32>, vector<8x8xf32>, vector<8x8xf32> -> vector<8x8xf32>
    %125 = vector.extract_strided_slice %9 {offsets = [8, 16], sizes = [8, 8], strides = [1, 1]} : vector<16x32xf32> to vector<8x8xf32>
    %126 = vector.extract_strided_slice %10 {offsets = [8, 16], sizes = [8, 8], strides = [1, 1]} : vector<16x32xf32> to vector<8x8xf32>
    %127 = vector.extract_strided_slice %11 {offsets = [8, 16], sizes = [8, 8], strides = [1, 1]} : vector<16x32xf32> to vector<8x8xf32>
    %cst_44 = arith.constant dense<0.000000e+00> : vector<8x8xf32>
    %128 = tpu.matmul %125, %126, %cst_44 {dimension_numbers = #tpu.dot_dimension_numbers<[1], [1], [0], [0], [0, 0, 1, 0], [], []>} : vector<8x8xf32>, vector<8x8xf32>, vector<8x8xf32> -> vector<8x8xf32>
    %cst_45 = arith.constant 0.353553385 : f32
    %129 = vector.broadcast %cst_45 : f32 to vector<8x8xf32>
    %130 = arith.mulf %128, %129 : vector<8x8xf32>
    %131 = arith.addf %130, %88 : vector<8x8xf32>
    %cst_46 = arith.constant dense<0xFF800000> : vector<8xf32>
    %132 = vector.multi_reduction <maximumf>, %131, %cst_46 [1] : vector<8x8xf32> to vector<8xf32>
    %133 = vector.shape_cast %132 : vector<8xf32> to vector<8x1xf32>
    %134 = vector.broadcast %133 : vector<8x1xf32> to vector<8x8xf32>
    %135 = arith.subf %131, %134 : vector<8x8xf32>
    %136 = math.exp %135 : vector<8x8xf32>
    %cst_47 = arith.constant dense<0.000000e+00> : vector<8xf32>
    %137 = vector.multi_reduction <add>, %136, %cst_47 [1] : vector<8x8xf32> to vector<8xf32>
    %138 = vector.shape_cast %137 : vector<8xf32> to vector<8x1xf32>
    %139 = tpu.reciprocal %138 : vector<8x1xf32> -> vector<8x1xf32>
    %140 = vector.broadcast %139 : vector<8x1xf32> to vector<8x8xf32>
    %141 = arith.mulf %136, %140 : vector<8x8xf32>
    %cst_48 = arith.constant dense<0.000000e+00> : vector<8x8xf32>
    %142 = tpu.matmul %141, %127, %cst_48 {dimension_numbers = #tpu.dot_dimension_numbers<[1], [0], [0], [1], [0, 0, 1, 1], [], []>} : vector<8x8xf32>, vector<8x8xf32>, vector<8x8xf32> -> vector<8x8xf32>
    %143 = vector.extract_strided_slice %9 {offsets = [8, 24], sizes = [8, 8], strides = [1, 1]} : vector<16x32xf32> to vector<8x8xf32>
    %144 = vector.extract_strided_slice %10 {offsets = [8, 24], sizes = [8, 8], strides = [1, 1]} : vector<16x32xf32> to vector<8x8xf32>
    %145 = vector.extract_strided_slice %11 {offsets = [8, 24], sizes = [8, 8], strides = [1, 1]} : vector<16x32xf32> to vector<8x8xf32>
    %cst_49 = arith.constant dense<0.000000e+00> : vector<8x8xf32>
    %146 = tpu.matmul %143, %144, %cst_49 {dimension_numbers = #tpu.dot_dimension_numbers<[1], [1], [0], [0], [0, 0, 1, 0], [], []>} : vector<8x8xf32>, vector<8x8xf32>, vector<8x8xf32> -> vector<8x8xf32>
    %cst_50 = arith.constant 0.353553385 : f32
    %147 = vector.broadcast %cst_50 : f32 to vector<8x8xf32>
    %148 = arith.mulf %146, %147 : vector<8x8xf32>
    %149 = arith.addf %148, %88 : vector<8x8xf32>
    %cst_51 = arith.constant dense<0xFF800000> : vector<8xf32>
    %150 = vector.multi_reduction <maximumf>, %149, %cst_51 [1] : vector<8x8xf32> to vector<8xf32>
    %151 = vector.shape_cast %150 : vector<8xf32> to vector<8x1xf32>
    %152 = vector.broadcast %151 : vector<8x1xf32> to vector<8x8xf32>
    %153 = arith.subf %149, %152 : vector<8x8xf32>
    %154 = math.exp %153 : vector<8x8xf32>
    %cst_52 = arith.constant dense<0.000000e+00> : vector<8xf32>
    %155 = vector.multi_reduction <add>, %154, %cst_52 [1] : vector<8x8xf32> to vector<8xf32>
    %156 = vector.shape_cast %155 : vector<8xf32> to vector<8x1xf32>
    %157 = tpu.reciprocal %156 : vector<8x1xf32> -> vector<8x1xf32>
    %158 = vector.broadcast %157 : vector<8x1xf32> to vector<8x8xf32>
    %159 = arith.mulf %154, %158 : vector<8x8xf32>
    %cst_53 = arith.constant dense<0.000000e+00> : vector<8x8xf32>
    %160 = tpu.matmul %159, %145, %cst_53 {dimension_numbers = #tpu.dot_dimension_numbers<[1], [0], [0], [1], [0, 0, 1, 1], [], []>} : vector<8x8xf32>, vector<8x8xf32>, vector<8x8xf32> -> vector<8x8xf32>
    %161 = tpu.concatenate %106, %124, %142, %160 in 1 : vector<8x8xf32>, vector<8x8xf32>, vector<8x8xf32>, vector<8x8xf32> -> vector<8x32xf32>
    %162 = tpu.concatenate %86, %161 in 0 : vector<8x32xf32>, vector<8x32xf32> -> vector<16x32xf32>
    %c0_54 = arith.constant 0 : index
    %c0_55 = arith.constant 0 : index
    %163 = vector.load %arg7[%c0_54, %c0_55] : memref<32x32xf32, #tpu.memory_space<vmem>>, vector<32x32xf32>
    %cst_56 = arith.constant dense<0.000000e+00> : vector<16x32xf32>
    %164 = tpu.matmul %162, %163, %cst_56 {dimension_numbers = #tpu.dot_dimension_numbers<[1], [0], [0], [1], [0, 0, 1, 1], [], []>} : vector<16x32xf32>, vector<32x32xf32>, vector<16x32xf32> -> vector<16x32xf32>
    %c0_57 = arith.constant 0 : index
    %c0_58 = arith.constant 0 : index
    %165 = vector.load %arg8[%c0_57, %c0_58] : memref<1x32xf32, #tpu.memory_space<vmem>>, vector<1x32xf32>
    %166 = vector.broadcast %165 : vector<1x32xf32> to vector<16x32xf32>
    %167 = arith.addf %164, %166 : vector<16x32xf32>
    %168 = arith.addf %1, %167 : vector<16x32xf32>
    %c0_59 = arith.constant 0 : index
    %c0_60 = arith.constant 0 : index
    %169 = vector.load %arg15[%c0_59, %c0_60] : memref<6x32xf32, #tpu.memory_space<vmem>>, vector<1x32xf32>
    %c1_61 = arith.constant 1 : index
    %c0_62 = arith.constant 0 : index
    %170 = vector.load %arg15[%c1_61, %c0_62] : memref<6x32xf32, #tpu.memory_space<vmem>>, vector<1x32xf32>
    %cst_63 = arith.constant dense<0.000000e+00> : vector<16xf32>
    %171 = vector.multi_reduction <add>, %168, %cst_63 [1] : vector<16x32xf32> to vector<16xf32>
    %172 = vector.shape_cast %171 : vector<16xf32> to vector<16x1xf32>
    %cst_64 = arith.constant 3.200000e+01 : f32
    %173 = vector.broadcast %cst_64 : f32 to vector<16x1xf32>
    %174 = arith.divf %172, %173 : vector<16x1xf32>
    %175 = arith.mulf %168, %168 : vector<16x32xf32>
    %cst_65 = arith.constant dense<0.000000e+00> : vector<16xf32>
    %176 = vector.multi_reduction <add>, %175, %cst_65 [1] : vector<16x32xf32> to vector<16xf32>
    %177 = vector.shape_cast %176 : vector<16xf32> to vector<16x1xf32>
    %cst_66 = arith.constant 3.200000e+01 : f32
    %178 = vector.broadcast %cst_66 : f32 to vector<16x1xf32>
    %179 = arith.divf %177, %178 : vector<16x1xf32>
    %180 = arith.mulf %174, %174 : vector<16x1xf32>
    %181 = arith.subf %179, %180 : vector<16x1xf32>
    %182 = vector.broadcast %174 : vector<16x1xf32> to vector<16x32xf32>
    %183 = arith.subf %168, %182 : vector<16x32xf32>
    %cst_67 = arith.constant 9.99999974E-6 : f32
    %184 = vector.broadcast %cst_67 : f32 to vector<16x1xf32>
    %185 = arith.addf %181, %184 : vector<16x1xf32>
    %186 = math.rsqrt %185 : vector<16x1xf32>
    %187 = vector.broadcast %186 : vector<16x1xf32> to vector<16x32xf32>
    %188 = arith.mulf %183, %187 : vector<16x32xf32>
    %189 = vector.broadcast %169 : vector<1x32xf32> to vector<16x32xf32>
    %190 = arith.mulf %188, %189 : vector<16x32xf32>
    %191 = vector.broadcast %170 : vector<1x32xf32> to vector<16x32xf32>
    %192 = arith.addf %190, %191 : vector<16x32xf32>
    %c0_68 = arith.constant 0 : index
    %c0_69 = arith.constant 0 : index
    %193 = vector.load %arg9[%c0_68, %c0_69] : memref<32x32xf32, #tpu.memory_space<vmem>>, vector<32x32xf32>
    %cst_70 = arith.constant dense<0.000000e+00> : vector<16x32xf32>
    %194 = tpu.matmul %192, %193, %cst_70 {dimension_numbers = #tpu.dot_dimension_numbers<[1], [0], [0], [1], [0, 0, 1, 1], [], []>} : vector<16x32xf32>, vector<32x32xf32>, vector<16x32xf32> -> vector<16x32xf32>
    %c0_71 = arith.constant 0 : index
    %c0_72 = arith.constant 0 : index
    %195 = vector.load %arg10[%c0_71, %c0_72] : memref<1x32xf32, #tpu.memory_space<vmem>>, vector<1x32xf32>
    %196 = vector.broadcast %195 : vector<1x32xf32> to vector<16x32xf32>
    %197 = arith.addf %194, %196 : vector<16x32xf32>
    %c0_73 = arith.constant 0 : index
    %c0_74 = arith.constant 0 : index
    %198 = vector.load %arg11[%c0_73, %c0_74] : memref<32x64xf32, #tpu.memory_space<vmem>>, vector<32x64xf32>
    %cst_75 = arith.constant dense<0.000000e+00> : vector<16x64xf32>
    %199 = tpu.matmul %3, %198, %cst_75 {dimension_numbers = #tpu.dot_dimension_numbers<[1], [0], [0], [1], [0, 0, 1, 1], [], []>} : vector<16x32xf32>, vector<32x64xf32>, vector<16x64xf32> -> vector<16x64xf32>
    %c0_76 = arith.constant 0 : index
    %c0_77 = arith.constant 0 : index
    %200 = vector.load %arg12[%c0_76, %c0_77] : memref<1x64xf32, #tpu.memory_space<vmem>>, vector<1x64xf32>
    %201 = vector.broadcast %200 : vector<1x64xf32> to vector<16x64xf32>
    %202 = arith.addf %199, %201 : vector<16x64xf32>
    %203 = vector.extract_strided_slice %202 {offsets = [0, 0], sizes = [16, 32], strides = [1, 1]} : vector<16x64xf32> to vector<16x32xf32>
    %204 = vector.extract_strided_slice %202 {offsets = [0, 32], sizes = [16, 32], strides = [1, 1]} : vector<16x64xf32> to vector<16x32xf32>
    %c0_78 = arith.constant 0 : index
    %c0_79 = arith.constant 0 : index
    %c0_80 = arith.constant 0 : index
    %205 = vector.load %arg4[%c0_78, %c0_79, %c0_80] : memref<2x1x8xf32, #tpu.memory_space<vmem>>, vector<1x1x8xf32>
    %206 = vector.shape_cast %205 : vector<1x1x8xf32> to vector<1x8xf32>
    %207 = vector.extract_strided_slice %197 {offsets = [0, 0], sizes = [8, 8], strides = [1, 1]} : vector<16x32xf32> to vector<8x8xf32>
    %208 = vector.extract_strided_slice %203 {offsets = [0, 0], sizes = [8, 8], strides = [1, 1]} : vector<16x32xf32> to vector<8x8xf32>
    %209 = vector.extract_strided_slice %204 {offsets = [0, 0], sizes = [8, 8], strides = [1, 1]} : vector<16x32xf32> to vector<8x8xf32>
    %cst_81 = arith.constant dense<0.000000e+00> : vector<8x8xf32>
    %210 = tpu.matmul %207, %208, %cst_81 {dimension_numbers = #tpu.dot_dimension_numbers<[1], [1], [0], [0], [0, 0, 1, 0], [], []>} : vector<8x8xf32>, vector<8x8xf32>, vector<8x8xf32> -> vector<8x8xf32>
    %cst_82 = arith.constant 0.353553385 : f32
    %211 = vector.broadcast %cst_82 : f32 to vector<8x8xf32>
    %212 = arith.mulf %210, %211 : vector<8x8xf32>
    %213 = vector.broadcast %206 : vector<1x8xf32> to vector<8x8xf32>
    %214 = arith.addf %212, %213 : vector<8x8xf32>
    %cst_83 = arith.constant dense<0xFF800000> : vector<8xf32>
    %215 = vector.multi_reduction <maximumf>, %214, %cst_83 [1] : vector<8x8xf32> to vector<8xf32>
    %216 = vector.shape_cast %215 : vector<8xf32> to vector<8x1xf32>
    %217 = vector.broadcast %216 : vector<8x1xf32> to vector<8x8xf32>
    %218 = arith.subf %214, %217 : vector<8x8xf32>
    %219 = math.exp %218 : vector<8x8xf32>
    %cst_84 = arith.constant dense<0.000000e+00> : vector<8xf32>
    %220 = vector.multi_reduction <add>, %219, %cst_84 [1] : vector<8x8xf32> to vector<8xf32>
    %221 = vector.shape_cast %220 : vector<8xf32> to vector<8x1xf32>
    %222 = tpu.reciprocal %221 : vector<8x1xf32> -> vector<8x1xf32>
    %223 = vector.broadcast %222 : vector<8x1xf32> to vector<8x8xf32>
    %224 = arith.mulf %219, %223 : vector<8x8xf32>
    %cst_85 = arith.constant dense<0.000000e+00> : vector<8x8xf32>
    %225 = tpu.matmul %224, %209, %cst_85 {dimension_numbers = #tpu.dot_dimension_numbers<[1], [0], [0], [1], [0, 0, 1, 1], [], []>} : vector<8x8xf32>, vector<8x8xf32>, vector<8x8xf32> -> vector<8x8xf32>
    %226 = vector.extract_strided_slice %197 {offsets = [0, 8], sizes = [8, 8], strides = [1, 1]} : vector<16x32xf32> to vector<8x8xf32>
    %227 = vector.extract_strided_slice %203 {offsets = [0, 8], sizes = [8, 8], strides = [1, 1]} : vector<16x32xf32> to vector<8x8xf32>
    %228 = vector.extract_strided_slice %204 {offsets = [0, 8], sizes = [8, 8], strides = [1, 1]} : vector<16x32xf32> to vector<8x8xf32>
    %cst_86 = arith.constant dense<0.000000e+00> : vector<8x8xf32>
    %229 = tpu.matmul %226, %227, %cst_86 {dimension_numbers = #tpu.dot_dimension_numbers<[1], [1], [0], [0], [0, 0, 1, 0], [], []>} : vector<8x8xf32>, vector<8x8xf32>, vector<8x8xf32> -> vector<8x8xf32>
    %cst_87 = arith.constant 0.353553385 : f32
    %230 = vector.broadcast %cst_87 : f32 to vector<8x8xf32>
    %231 = arith.mulf %229, %230 : vector<8x8xf32>
    %232 = vector.broadcast %206 : vector<1x8xf32> to vector<8x8xf32>
    %233 = arith.addf %231, %232 : vector<8x8xf32>
    %cst_88 = arith.constant dense<0xFF800000> : vector<8xf32>
    %234 = vector.multi_reduction <maximumf>, %233, %cst_88 [1] : vector<8x8xf32> to vector<8xf32>
    %235 = vector.shape_cast %234 : vector<8xf32> to vector<8x1xf32>
    %236 = vector.broadcast %235 : vector<8x1xf32> to vector<8x8xf32>
    %237 = arith.subf %233, %236 : vector<8x8xf32>
    %238 = math.exp %237 : vector<8x8xf32>
    %cst_89 = arith.constant dense<0.000000e+00> : vector<8xf32>
    %239 = vector.multi_reduction <add>, %238, %cst_89 [1] : vector<8x8xf32> to vector<8xf32>
    %240 = vector.shape_cast %239 : vector<8xf32> to vector<8x1xf32>
    %241 = tpu.reciprocal %240 : vector<8x1xf32> -> vector<8x1xf32>
    %242 = vector.broadcast %241 : vector<8x1xf32> to vector<8x8xf32>
    %243 = arith.mulf %238, %242 : vector<8x8xf32>
    %cst_90 = arith.constant dense<0.000000e+00> : vector<8x8xf32>
    %244 = tpu.matmul %243, %228, %cst_90 {dimension_numbers = #tpu.dot_dimension_numbers<[1], [0], [0], [1], [0, 0, 1, 1], [], []>} : vector<8x8xf32>, vector<8x8xf32>, vector<8x8xf32> -> vector<8x8xf32>
    %245 = vector.extract_strided_slice %197 {offsets = [0, 16], sizes = [8, 8], strides = [1, 1]} : vector<16x32xf32> to vector<8x8xf32>
    %246 = vector.extract_strided_slice %203 {offsets = [0, 16], sizes = [8, 8], strides = [1, 1]} : vector<16x32xf32> to vector<8x8xf32>
    %247 = vector.extract_strided_slice %204 {offsets = [0, 16], sizes = [8, 8], strides = [1, 1]} : vector<16x32xf32> to vector<8x8xf32>
    %cst_91 = arith.constant dense<0.000000e+00> : vector<8x8xf32>
    %248 = tpu.matmul %245, %246, %cst_91 {dimension_numbers = #tpu.dot_dimension_numbers<[1], [1], [0], [0], [0, 0, 1, 0], [], []>} : vector<8x8xf32>, vector<8x8xf32>, vector<8x8xf32> -> vector<8x8xf32>
    %cst_92 = arith.constant 0.353553385 : f32
    %249 = vector.broadcast %cst_92 : f32 to vector<8x8xf32>
    %250 = arith.mulf %248, %249 : vector<8x8xf32>
    %251 = vector.broadcast %206 : vector<1x8xf32> to vector<8x8xf32>
    %252 = arith.addf %250, %251 : vector<8x8xf32>
    %cst_93 = arith.constant dense<0xFF800000> : vector<8xf32>
    %253 = vector.multi_reduction <maximumf>, %252, %cst_93 [1] : vector<8x8xf32> to vector<8xf32>
    %254 = vector.shape_cast %253 : vector<8xf32> to vector<8x1xf32>
    %255 = vector.broadcast %254 : vector<8x1xf32> to vector<8x8xf32>
    %256 = arith.subf %252, %255 : vector<8x8xf32>
    %257 = math.exp %256 : vector<8x8xf32>
    %cst_94 = arith.constant dense<0.000000e+00> : vector<8xf32>
    %258 = vector.multi_reduction <add>, %257, %cst_94 [1] : vector<8x8xf32> to vector<8xf32>
    %259 = vector.shape_cast %258 : vector<8xf32> to vector<8x1xf32>
    %260 = tpu.reciprocal %259 : vector<8x1xf32> -> vector<8x1xf32>
    %261 = vector.broadcast %260 : vector<8x1xf32> to vector<8x8xf32>
    %262 = arith.mulf %257, %261 : vector<8x8xf32>
    %cst_95 = arith.constant dense<0.000000e+00> : vector<8x8xf32>
    %263 = tpu.matmul %262, %247, %cst_95 {dimension_numbers = #tpu.dot_dimension_numbers<[1], [0], [0], [1], [0, 0, 1, 1], [], []>} : vector<8x8xf32>, vector<8x8xf32>, vector<8x8xf32> -> vector<8x8xf32>
    %264 = vector.extract_strided_slice %197 {offsets = [0, 24], sizes = [8, 8], strides = [1, 1]} : vector<16x32xf32> to vector<8x8xf32>
    %265 = vector.extract_strided_slice %203 {offsets = [0, 24], sizes = [8, 8], strides = [1, 1]} : vector<16x32xf32> to vector<8x8xf32>
    %266 = vector.extract_strided_slice %204 {offsets = [0, 24], sizes = [8, 8], strides = [1, 1]} : vector<16x32xf32> to vector<8x8xf32>
    %cst_96 = arith.constant dense<0.000000e+00> : vector<8x8xf32>
    %267 = tpu.matmul %264, %265, %cst_96 {dimension_numbers = #tpu.dot_dimension_numbers<[1], [1], [0], [0], [0, 0, 1, 0], [], []>} : vector<8x8xf32>, vector<8x8xf32>, vector<8x8xf32> -> vector<8x8xf32>
    %cst_97 = arith.constant 0.353553385 : f32
    %268 = vector.broadcast %cst_97 : f32 to vector<8x8xf32>
    %269 = arith.mulf %267, %268 : vector<8x8xf32>
    %270 = vector.broadcast %206 : vector<1x8xf32> to vector<8x8xf32>
    %271 = arith.addf %269, %270 : vector<8x8xf32>
    %cst_98 = arith.constant dense<0xFF800000> : vector<8xf32>
    %272 = vector.multi_reduction <maximumf>, %271, %cst_98 [1] : vector<8x8xf32> to vector<8xf32>
    %273 = vector.shape_cast %272 : vector<8xf32> to vector<8x1xf32>
    %274 = vector.broadcast %273 : vector<8x1xf32> to vector<8x8xf32>
    %275 = arith.subf %271, %274 : vector<8x8xf32>
    %276 = math.exp %275 : vector<8x8xf32>
    %cst_99 = arith.constant dense<0.000000e+00> : vector<8xf32>
    %277 = vector.multi_reduction <add>, %276, %cst_99 [1] : vector<8x8xf32> to vector<8xf32>
    %278 = vector.shape_cast %277 : vector<8xf32> to vector<8x1xf32>
    %279 = tpu.reciprocal %278 : vector<8x1xf32> -> vector<8x1xf32>
    %280 = vector.broadcast %279 : vector<8x1xf32> to vector<8x8xf32>
    %281 = arith.mulf %276, %280 : vector<8x8xf32>
    %cst_100 = arith.constant dense<0.000000e+00> : vector<8x8xf32>
    %282 = tpu.matmul %281, %266, %cst_100 {dimension_numbers = #tpu.dot_dimension_numbers<[1], [0], [0], [1], [0, 0, 1, 1], [], []>} : vector<8x8xf32>, vector<8x8xf32>, vector<8x8xf32> -> vector<8x8xf32>
    %283 = tpu.concatenate %225, %244, %263, %282 in 1 : vector<8x8xf32>, vector<8x8xf32>, vector<8x8xf32>, vector<8x8xf32> -> vector<8x32xf32>
    %c1_101 = arith.constant 1 : index
    %c0_102 = arith.constant 0 : index
    %c0_103 = arith.constant 0 : index
    %284 = vector.load %arg4[%c1_101, %c0_102, %c0_103] : memref<2x1x8xf32, #tpu.memory_space<vmem>>, vector<1x1x8xf32>
    %285 = vector.shape_cast %284 : vector<1x1x8xf32> to vector<1x8xf32>
    %286 = vector.extract_strided_slice %197 {offsets = [8, 0], sizes = [8, 8], strides = [1, 1]} : vector<16x32xf32> to vector<8x8xf32>
    %287 = vector.extract_strided_slice %203 {offsets = [8, 0], sizes = [8, 8], strides = [1, 1]} : vector<16x32xf32> to vector<8x8xf32>
    %288 = vector.extract_strided_slice %204 {offsets = [8, 0], sizes = [8, 8], strides = [1, 1]} : vector<16x32xf32> to vector<8x8xf32>
    %cst_104 = arith.constant dense<0.000000e+00> : vector<8x8xf32>
    %289 = tpu.matmul %286, %287, %cst_104 {dimension_numbers = #tpu.dot_dimension_numbers<[1], [1], [0], [0], [0, 0, 1, 0], [], []>} : vector<8x8xf32>, vector<8x8xf32>, vector<8x8xf32> -> vector<8x8xf32>
    %cst_105 = arith.constant 0.353553385 : f32
    %290 = vector.broadcast %cst_105 : f32 to vector<8x8xf32>
    %291 = arith.mulf %289, %290 : vector<8x8xf32>
    %292 = vector.broadcast %285 : vector<1x8xf32> to vector<8x8xf32>
    %293 = arith.addf %291, %292 : vector<8x8xf32>
    %cst_106 = arith.constant dense<0xFF800000> : vector<8xf32>
    %294 = vector.multi_reduction <maximumf>, %293, %cst_106 [1] : vector<8x8xf32> to vector<8xf32>
    %295 = vector.shape_cast %294 : vector<8xf32> to vector<8x1xf32>
    %296 = vector.broadcast %295 : vector<8x1xf32> to vector<8x8xf32>
    %297 = arith.subf %293, %296 : vector<8x8xf32>
    %298 = math.exp %297 : vector<8x8xf32>
    %cst_107 = arith.constant dense<0.000000e+00> : vector<8xf32>
    %299 = vector.multi_reduction <add>, %298, %cst_107 [1] : vector<8x8xf32> to vector<8xf32>
    %300 = vector.shape_cast %299 : vector<8xf32> to vector<8x1xf32>
    %301 = tpu.reciprocal %300 : vector<8x1xf32> -> vector<8x1xf32>
    %302 = vector.broadcast %301 : vector<8x1xf32> to vector<8x8xf32>
    %303 = arith.mulf %298, %302 : vector<8x8xf32>
    %cst_108 = arith.constant dense<0.000000e+00> : vector<8x8xf32>
    %304 = tpu.matmul %303, %288, %cst_108 {dimension_numbers = #tpu.dot_dimension_numbers<[1], [0], [0], [1], [0, 0, 1, 1], [], []>} : vector<8x8xf32>, vector<8x8xf32>, vector<8x8xf32> -> vector<8x8xf32>
    %305 = vector.extract_strided_slice %197 {offsets = [8, 8], sizes = [8, 8], strides = [1, 1]} : vector<16x32xf32> to vector<8x8xf32>
    %306 = vector.extract_strided_slice %203 {offsets = [8, 8], sizes = [8, 8], strides = [1, 1]} : vector<16x32xf32> to vector<8x8xf32>
    %307 = vector.extract_strided_slice %204 {offsets = [8, 8], sizes = [8, 8], strides = [1, 1]} : vector<16x32xf32> to vector<8x8xf32>
    %cst_109 = arith.constant dense<0.000000e+00> : vector<8x8xf32>
    %308 = tpu.matmul %305, %306, %cst_109 {dimension_numbers = #tpu.dot_dimension_numbers<[1], [1], [0], [0], [0, 0, 1, 0], [], []>} : vector<8x8xf32>, vector<8x8xf32>, vector<8x8xf32> -> vector<8x8xf32>
    %cst_110 = arith.constant 0.353553385 : f32
    %309 = vector.broadcast %cst_110 : f32 to vector<8x8xf32>
    %310 = arith.mulf %308, %309 : vector<8x8xf32>
    %311 = vector.broadcast %285 : vector<1x8xf32> to vector<8x8xf32>
    %312 = arith.addf %310, %311 : vector<8x8xf32>
    %cst_111 = arith.constant dense<0xFF800000> : vector<8xf32>
    %313 = vector.multi_reduction <maximumf>, %312, %cst_111 [1] : vector<8x8xf32> to vector<8xf32>
    %314 = vector.shape_cast %313 : vector<8xf32> to vector<8x1xf32>
    %315 = vector.broadcast %314 : vector<8x1xf32> to vector<8x8xf32>
    %316 = arith.subf %312, %315 : vector<8x8xf32>
    %317 = math.exp %316 : vector<8x8xf32>
    %cst_112 = arith.constant dense<0.000000e+00> : vector<8xf32>
    %318 = vector.multi_reduction <add>, %317, %cst_112 [1] : vector<8x8xf32> to vector<8xf32>
    %319 = vector.shape_cast %318 : vector<8xf32> to vector<8x1xf32>
    %320 = tpu.reciprocal %319 : vector<8x1xf32> -> vector<8x1xf32>
    %321 = vector.broadcast %320 : vector<8x1xf32> to vector<8x8xf32>
    %322 = arith.mulf %317, %321 : vector<8x8xf32>
    %cst_113 = arith.constant dense<0.000000e+00> : vector<8x8xf32>
    %323 = tpu.matmul %322, %307, %cst_113 {dimension_numbers = #tpu.dot_dimension_numbers<[1], [0], [0], [1], [0, 0, 1, 1], [], []>} : vector<8x8xf32>, vector<8x8xf32>, vector<8x8xf32> -> vector<8x8xf32>
    %324 = vector.extract_strided_slice %197 {offsets = [8, 16], sizes = [8, 8], strides = [1, 1]} : vector<16x32xf32> to vector<8x8xf32>
    %325 = vector.extract_strided_slice %203 {offsets = [8, 16], sizes = [8, 8], strides = [1, 1]} : vector<16x32xf32> to vector<8x8xf32>
    %326 = vector.extract_strided_slice %204 {offsets = [8, 16], sizes = [8, 8], strides = [1, 1]} : vector<16x32xf32> to vector<8x8xf32>
    %cst_114 = arith.constant dense<0.000000e+00> : vector<8x8xf32>
    %327 = tpu.matmul %324, %325, %cst_114 {dimension_numbers = #tpu.dot_dimension_numbers<[1], [1], [0], [0], [0, 0, 1, 0], [], []>} : vector<8x8xf32>, vector<8x8xf32>, vector<8x8xf32> -> vector<8x8xf32>
    %cst_115 = arith.constant 0.353553385 : f32
    %328 = vector.broadcast %cst_115 : f32 to vector<8x8xf32>
    %329 = arith.mulf %327, %328 : vector<8x8xf32>
    %330 = vector.broadcast %285 : vector<1x8xf32> to vector<8x8xf32>
    %331 = arith.addf %329, %330 : vector<8x8xf32>
    %cst_116 = arith.constant dense<0xFF800000> : vector<8xf32>
    %332 = vector.multi_reduction <maximumf>, %331, %cst_116 [1] : vector<8x8xf32> to vector<8xf32>
    %333 = vector.shape_cast %332 : vector<8xf32> to vector<8x1xf32>
    %334 = vector.broadcast %333 : vector<8x1xf32> to vector<8x8xf32>
    %335 = arith.subf %331, %334 : vector<8x8xf32>
    %336 = math.exp %335 : vector<8x8xf32>
    %cst_117 = arith.constant dense<0.000000e+00> : vector<8xf32>
    %337 = vector.multi_reduction <add>, %336, %cst_117 [1] : vector<8x8xf32> to vector<8xf32>
    %338 = vector.shape_cast %337 : vector<8xf32> to vector<8x1xf32>
    %339 = tpu.reciprocal %338 : vector<8x1xf32> -> vector<8x1xf32>
    %340 = vector.broadcast %339 : vector<8x1xf32> to vector<8x8xf32>
    %341 = arith.mulf %336, %340 : vector<8x8xf32>
    %cst_118 = arith.constant dense<0.000000e+00> : vector<8x8xf32>
    %342 = tpu.matmul %341, %326, %cst_118 {dimension_numbers = #tpu.dot_dimension_numbers<[1], [0], [0], [1], [0, 0, 1, 1], [], []>} : vector<8x8xf32>, vector<8x8xf32>, vector<8x8xf32> -> vector<8x8xf32>
    %343 = vector.extract_strided_slice %197 {offsets = [8, 24], sizes = [8, 8], strides = [1, 1]} : vector<16x32xf32> to vector<8x8xf32>
    %344 = vector.extract_strided_slice %203 {offsets = [8, 24], sizes = [8, 8], strides = [1, 1]} : vector<16x32xf32> to vector<8x8xf32>
    %345 = vector.extract_strided_slice %204 {offsets = [8, 24], sizes = [8, 8], strides = [1, 1]} : vector<16x32xf32> to vector<8x8xf32>
    %cst_119 = arith.constant dense<0.000000e+00> : vector<8x8xf32>
    %346 = tpu.matmul %343, %344, %cst_119 {dimension_numbers = #tpu.dot_dimension_numbers<[1], [1], [0], [0], [0, 0, 1, 0], [], []>} : vector<8x8xf32>, vector<8x8xf32>, vector<8x8xf32> -> vector<8x8xf32>
    %cst_120 = arith.constant 0.353553385 : f32
    %347 = vector.broadcast %cst_120 : f32 to vector<8x8xf32>
    %348 = arith.mulf %346, %347 : vector<8x8xf32>
    %349 = vector.broadcast %285 : vector<1x8xf32> to vector<8x8xf32>
    %350 = arith.addf %348, %349 : vector<8x8xf32>
    %cst_121 = arith.constant dense<0xFF800000> : vector<8xf32>
    %351 = vector.multi_reduction <maximumf>, %350, %cst_121 [1] : vector<8x8xf32> to vector<8xf32>
    %352 = vector.shape_cast %351 : vector<8xf32> to vector<8x1xf32>
    %353 = vector.broadcast %352 : vector<8x1xf32> to vector<8x8xf32>
    %354 = arith.subf %350, %353 : vector<8x8xf32>
    %355 = math.exp %354 : vector<8x8xf32>
    %cst_122 = arith.constant dense<0.000000e+00> : vector<8xf32>
    %356 = vector.multi_reduction <add>, %355, %cst_122 [1] : vector<8x8xf32> to vector<8xf32>
    %357 = vector.shape_cast %356 : vector<8xf32> to vector<8x1xf32>
    %358 = tpu.reciprocal %357 : vector<8x1xf32> -> vector<8x1xf32>
    %359 = vector.broadcast %358 : vector<8x1xf32> to vector<8x8xf32>
    %360 = arith.mulf %355, %359 : vector<8x8xf32>
    %cst_123 = arith.constant dense<0.000000e+00> : vector<8x8xf32>
    %361 = tpu.matmul %360, %345, %cst_123 {dimension_numbers = #tpu.dot_dimension_numbers<[1], [0], [0], [1], [0, 0, 1, 1], [], []>} : vector<8x8xf32>, vector<8x8xf32>, vector<8x8xf32> -> vector<8x8xf32>
    %362 = tpu.concatenate %304, %323, %342, %361 in 1 : vector<8x8xf32>, vector<8x8xf32>, vector<8x8xf32>, vector<8x8xf32> -> vector<8x32xf32>
    %363 = tpu.concatenate %283, %362 in 0 : vector<8x32xf32>, vector<8x32xf32> -> vector<16x32xf32>
    %c0_124 = arith.constant 0 : index
    %c0_125 = arith.constant 0 : index
    %364 = vector.load %arg13[%c0_124, %c0_125] : memref<32x32xf32, #tpu.memory_space<vmem>>, vector<32x32xf32>
    %cst_126 = arith.constant dense<0.000000e+00> : vector<16x32xf32>
    %365 = tpu.matmul %363, %364, %cst_126 {dimension_numbers = #tpu.dot_dimension_numbers<[1], [0], [0], [1], [0, 0, 1, 1], [], []>} : vector<16x32xf32>, vector<32x32xf32>, vector<16x32xf32> -> vector<16x32xf32>
    %c0_127 = arith.constant 0 : index
    %c0_128 = arith.constant 0 : index
    %366 = vector.load %arg14[%c0_127, %c0_128] : memref<1x32xf32, #tpu.memory_space<vmem>>, vector<1x32xf32>
    %367 = vector.broadcast %366 : vector<1x32xf32> to vector<16x32xf32>
    %368 = arith.addf %365, %367 : vector<16x32xf32>
    %369 = arith.addf %192, %368 : vector<16x32xf32>
    %c2 = arith.constant 2 : index
    %c0_129 = arith.constant 0 : index
    %370 = vector.load %arg15[%c2, %c0_129] : memref<6x32xf32, #tpu.memory_space<vmem>>, vector<1x32xf32>
    %c3 = arith.constant 3 : index
    %c0_130 = arith.constant 0 : index
    %371 = vector.load %arg15[%c3, %c0_130] : memref<6x32xf32, #tpu.memory_space<vmem>>, vector<1x32xf32>
    %cst_131 = arith.constant dense<0.000000e+00> : vector<16xf32>
    %372 = vector.multi_reduction <add>, %369, %cst_131 [1] : vector<16x32xf32> to vector<16xf32>
    %373 = vector.shape_cast %372 : vector<16xf32> to vector<16x1xf32>
    %cst_132 = arith.constant 3.200000e+01 : f32
    %374 = vector.broadcast %cst_132 : f32 to vector<16x1xf32>
    %375 = arith.divf %373, %374 : vector<16x1xf32>
    %376 = arith.mulf %369, %369 : vector<16x32xf32>
    %cst_133 = arith.constant dense<0.000000e+00> : vector<16xf32>
    %377 = vector.multi_reduction <add>, %376, %cst_133 [1] : vector<16x32xf32> to vector<16xf32>
    %378 = vector.shape_cast %377 : vector<16xf32> to vector<16x1xf32>
    %cst_134 = arith.constant 3.200000e+01 : f32
    %379 = vector.broadcast %cst_134 : f32 to vector<16x1xf32>
    %380 = arith.divf %378, %379 : vector<16x1xf32>
    %381 = arith.mulf %375, %375 : vector<16x1xf32>
    %382 = arith.subf %380, %381 : vector<16x1xf32>
    %383 = vector.broadcast %375 : vector<16x1xf32> to vector<16x32xf32>
    %384 = arith.subf %369, %383 : vector<16x32xf32>
    %cst_135 = arith.constant 9.99999974E-6 : f32
    %385 = vector.broadcast %cst_135 : f32 to vector<16x1xf32>
    %386 = arith.addf %382, %385 : vector<16x1xf32>
    %387 = math.rsqrt %386 : vector<16x1xf32>
    %388 = vector.broadcast %387 : vector<16x1xf32> to vector<16x32xf32>
    %389 = arith.mulf %384, %388 : vector<16x32xf32>
    %390 = vector.broadcast %370 : vector<1x32xf32> to vector<16x32xf32>
    %391 = arith.mulf %389, %390 : vector<16x32xf32>
    %392 = vector.broadcast %371 : vector<1x32xf32> to vector<16x32xf32>
    %393 = arith.addf %391, %392 : vector<16x32xf32>
    %c0_136 = arith.constant 0 : index
    %c0_137 = arith.constant 0 : index
    %394 = vector.load %arg16[%c0_136, %c0_137] : memref<32x64xf32, #tpu.memory_space<vmem>>, vector<32x64xf32>
    %cst_138 = arith.constant dense<0.000000e+00> : vector<16x64xf32>
    %395 = tpu.matmul %393, %394, %cst_138 {dimension_numbers = #tpu.dot_dimension_numbers<[1], [0], [0], [1], [0, 0, 1, 1], [], []>} : vector<16x32xf32>, vector<32x64xf32>, vector<16x64xf32> -> vector<16x64xf32>
    %c0_139 = arith.constant 0 : index
    %c0_140 = arith.constant 0 : index
    %396 = vector.load %arg17[%c0_139, %c0_140] : memref<1x64xf32, #tpu.memory_space<vmem>>, vector<1x64xf32>
    %397 = vector.broadcast %396 : vector<1x64xf32> to vector<16x64xf32>
    %398 = arith.addf %395, %397 : vector<16x64xf32>
    %cst_141 = arith.constant 0.000000e+00 : f32
    %399 = vector.broadcast %cst_141 : f32 to vector<16x64xf32>
    %400 = arith.maximumf %398, %399 : vector<16x64xf32>
    %c0_142 = arith.constant 0 : index
    %c0_143 = arith.constant 0 : index
    %401 = vector.load %arg18[%c0_142, %c0_143] : memref<64x32xf32, #tpu.memory_space<vmem>>, vector<64x32xf32>
    %cst_144 = arith.constant dense<0.000000e+00> : vector<16x32xf32>
    %402 = tpu.matmul %400, %401, %cst_144 {dimension_numbers = #tpu.dot_dimension_numbers<[1], [0], [0], [1], [0, 0, 1, 1], [], []>} : vector<16x64xf32>, vector<64x32xf32>, vector<16x32xf32> -> vector<16x32xf32>
    %c0_145 = arith.constant 0 : index
    %c0_146 = arith.constant 0 : index
    %403 = vector.load %arg19[%c0_145, %c0_146] : memref<1x32xf32, #tpu.memory_space<vmem>>, vector<1x32xf32>
    %404 = vector.broadcast %403 : vector<1x32xf32> to vector<16x32xf32>
    %405 = arith.addf %402, %404 : vector<16x32xf32>
    %406 = arith.addf %393, %405 : vector<16x32xf32>
    %c4 = arith.constant 4 : index
    %c0_147 = arith.constant 0 : index
    %407 = vector.load %arg15[%c4, %c0_147] : memref<6x32xf32, #tpu.memory_space<vmem>>, vector<1x32xf32>
    %c5 = arith.constant 5 : index
    %c0_148 = arith.constant 0 : index
    %408 = vector.load %arg15[%c5, %c0_148] : memref<6x32xf32, #tpu.memory_space<vmem>>, vector<1x32xf32>
    %cst_149 = arith.constant dense<0.000000e+00> : vector<16xf32>
    %409 = vector.multi_reduction <add>, %406, %cst_149 [1] : vector<16x32xf32> to vector<16xf32>
    %410 = vector.shape_cast %409 : vector<16xf32> to vector<16x1xf32>
    %cst_150 = arith.constant 3.200000e+01 : f32
    %411 = vector.broadcast %cst_150 : f32 to vector<16x1xf32>
    %412 = arith.divf %410, %411 : vector<16x1xf32>
    %413 = arith.mulf %406, %406 : vector<16x32xf32>
    %cst_151 = arith.constant dense<0.000000e+00> : vector<16xf32>
    %414 = vector.multi_reduction <add>, %413, %cst_151 [1] : vector<16x32xf32> to vector<16xf32>
    %415 = vector.shape_cast %414 : vector<16xf32> to vector<16x1xf32>
    %cst_152 = arith.constant 3.200000e+01 : f32
    %416 = vector.broadcast %cst_152 : f32 to vector<16x1xf32>
    %417 = arith.divf %415, %416 : vector<16x1xf32>
    %418 = arith.mulf %412, %412 : vector<16x1xf32>
    %419 = arith.subf %417, %418 : vector<16x1xf32>
    %420 = vector.broadcast %412 : vector<16x1xf32> to vector<16x32xf32>
    %421 = arith.subf %406, %420 : vector<16x32xf32>
    %cst_153 = arith.constant 9.99999974E-6 : f32
    %422 = vector.broadcast %cst_153 : f32 to vector<16x1xf32>
    %423 = arith.addf %419, %422 : vector<16x1xf32>
    %424 = math.rsqrt %423 : vector<16x1xf32>
    %425 = vector.broadcast %424 : vector<16x1xf32> to vector<16x32xf32>
    %426 = arith.mulf %421, %425 : vector<16x32xf32>
    %427 = vector.broadcast %407 : vector<1x32xf32> to vector<16x32xf32>
    %428 = arith.mulf %426, %427 : vector<16x32xf32>
    %429 = vector.broadcast %408 : vector<1x32xf32> to vector<16x32xf32>
    %430 = arith.addf %428, %429 : vector<16x32xf32>
    %431 = vector.shape_cast %430 : vector<16x32xf32> to vector<2x8x32xf32>
    %c0_154 = arith.constant 0 : index
    %c0_155 = arith.constant 0 : index
    %c0_156 = arith.constant 0 : index
    %432 = vector.load %arg20[%c0_154, %c0_155, %c0_156] : memref<2x8x32xf32, #tpu.memory_space<vmem>>, vector<2x8x32xf32>
    tpu.vector_store %arg20[%c0_154, %c0_155, %c0_156], %431 {strides = array<i32>} : memref<2x8x32xf32, #tpu.memory_space<vmem>>, vector<2x8x32xf32>,
    return
  }
  func.func @transform_0(%arg0: i32) -> (i32, i32, i32) {
    %c0_i32 = arith.constant 0 : i32
    %c0_i32_0 = arith.constant 0 : i32
    %c0_i32_1 = arith.constant 0 : i32
    return %arg0, %c0_i32, %c0_i32_0 : i32, i32, i32
  }
  func.func @transform_1(%arg0: i32) -> (i32, i32, i32) {
    %c0_i32 = arith.constant 0 : i32
    %c0_i32_0 = arith.constant 0 : i32
    %c0_i32_1 = arith.constant 0 : i32
    return %arg0, %c0_i32, %c0_i32_0 : i32, i32, i32
  }
  func.func @transform_2(%arg0: i32) -> (i32, i32, i32) {
    %c0_i32 = arith.constant 0 : i32
    %c0_i32_0 = arith.constant 0 : i32
    %c0_i32_1 = arith.constant 0 : i32
    return %arg0, %c0_i32, %c0_i32_0 : i32, i32, i32
  }
  func.func @transform_3(%arg0: i32) -> (i32, i32, i32) {
    %c0_i32 = arith.constant 0 : i32
    %c0_i32_0 = arith.constant 0 : i32
    %c0_i32_1 = arith.constant 0 : i32
    return %arg0, %c0_i32, %c0_i32_0 : i32, i32, i32
  }
  func.func @transform_4(%arg0: i32) -> (i32, i32) {
    %c0_i32 = arith.constant 0 : i32
    %c0_i32_0 = arith.constant 0 : i32
    %c0_i32_1 = arith.constant 0 : i32
    return %c0_i32, %c0_i32_0 : i32, i32
  }
  func.func @transform_5(%arg0: i32) -> (i32, i32) {
    %c0_i32 = arith.constant 0 : i32
    %c0_i32_0 = arith.constant 0 : i32
    %c0_i32_1 = arith.constant 0 : i32
    return %c0_i32, %c0_i32_0 : i32, i32
  }
  func.func @transform_6(%arg0: i32) -> (i32, i32) {
    %c0_i32 = arith.constant 0 : i32
    %c0_i32_0 = arith.constant 0 : i32
    %c0_i32_1 = arith.constant 0 : i32
    return %c0_i32, %c0_i32_0 : i32, i32
  }
  func.func @transform_7(%arg0: i32) -> (i32, i32) {
    %c0_i32 = arith.constant 0 : i32
    %c0_i32_0 = arith.constant 0 : i32
    %c0_i32_1 = arith.constant 0 : i32
    return %c0_i32, %c0_i32_0 : i32, i32
  }
  func.func @transform_8(%arg0: i32) -> (i32, i32) {
    %c0_i32 = arith.constant 0 : i32
    %c0_i32_0 = arith.constant 0 : i32
    %c0_i32_1 = arith.constant 0 : i32
    return %c0_i32, %c0_i32_0 : i32, i32
  }
  func.func @transform_9(%arg0: i32) -> (i32, i32) {
    %c0_i32 = arith.constant 0 : i32
    %c0_i32_0 = arith.constant 0 : i32
    %c0_i32_1 = arith.constant 0 : i32
    return %c0_i32, %c0_i32_0 : i32, i32
  }
  func.func @transform_10(%arg0: i32) -> (i32, i32) {
    %c0_i32 = arith.constant 0 : i32
    %c0_i32_0 = arith.constant 0 : i32
    %c0_i32_1 = arith.constant 0 : i32
    return %c0_i32, %c0_i32_0 : i32, i32
  }
  func.func @transform_11(%arg0: i32) -> (i32, i32) {
    %c0_i32 = arith.constant 0 : i32
    %c0_i32_0 = arith.constant 0 : i32
    %c0_i32_1 = arith.constant 0 : i32
    return %c0_i32, %c0_i32_0 : i32, i32
  }
  func.func @transform_12(%arg0: i32) -> (i32, i32) {
    %c0_i32 = arith.constant 0 : i32
    %c0_i32_0 = arith.constant 0 : i32
    %c0_i32_1 = arith.constant 0 : i32
    return %c0_i32, %c0_i32_0 : i32, i32
  }
  func.func @transform_13(%arg0: i32) -> (i32, i32) {
    %c0_i32 = arith.constant 0 : i32
    %c0_i32_0 = arith.constant 0 : i32
    %c0_i32_1 = arith.constant 0 : i32
    return %c0_i32, %c0_i32_0 : i32, i32
  }
  func.func @transform_14(%arg0: i32) -> (i32, i32) {
    %c0_i32 = arith.constant 0 : i32
    %c0_i32_0 = arith.constant 0 : i32
    %c0_i32_1 = arith.constant 0 : i32
    return %c0_i32, %c0_i32_0 : i32, i32
  }
  func.func @transform_15(%arg0: i32) -> (i32, i32) {
    %c0_i32 = arith.constant 0 : i32
    %c0_i32_0 = arith.constant 0 : i32
    %c0_i32_1 = arith.constant 0 : i32
    return %c0_i32, %c0_i32_0 : i32, i32
  }
  func.func @transform_16(%arg0: i32) -> (i32, i32) {
    %c0_i32 = arith.constant 0 : i32
    %c0_i32_0 = arith.constant 0 : i32
    %c0_i32_1 = arith.constant 0 : i32
    return %c0_i32, %c0_i32_0 : i32, i32
  }
  func.func @transform_17(%arg0: i32) -> (i32, i32) {
    %c0_i32 = arith.constant 0 : i32
    %c0_i32_0 = arith.constant 0 : i32
    %c0_i32_1 = arith.constant 0 : i32
    return %c0_i32, %c0_i32_0 : i32, i32
  }
  func.func @transform_18(%arg0: i32) -> (i32, i32) {
    %c0_i32 = arith.constant 0 : i32
    %c0_i32_0 = arith.constant 0 : i32
    %c0_i32_1 = arith.constant 0 : i32
    return %c0_i32, %c0_i32_0 : i32, i32
  }
  func.func @transform_19(%arg0: i32) -> (i32, i32, i32) {
    %c0_i32 = arith.constant 0 : i32
    %c0_i32_0 = arith.constant 0 : i32
    %c0_i32_1 = arith.constant 0 : i32
    return %arg0, %c0_i32, %c0_i32_0 : i32, i32, i32
  }
}

</mosaic_0001>

<bundles_post_ra>
// kernel: tpu_custom_call.1
= control target key start
LH: loop header
LB: loop body
LE: loop exit
PB: predicated region body
PF: predicated region fallthrough
CT: control target
= control target key end

     0   :  { %s3151_s0 = inlined_call_operand.hbm [shape: f32[2,8,32], index: 0, kind: input, shape index: {}]   ;;  %s3152_s1 = inlined_call_operand.hbm [shape: f32[2,8,32], index: 1, kind: input, shape index: {}]   ;;  %s3153_s2 = inlined_call_operand.hbm [shape: f32[2,8,8], index: 2, kind: input, shape index: {}]   ;;  %s3154_s3 = inlined_call_operand.hbm [shape: f32[2,1,8], index: 3, kind: input, shape index: {}]   ;;  %s3155_s4 = inlined_call_operand.vmem [shape: f32[32,96], index: 4, kind: input, shape index: {}]   ;;  %s3156_s5 = inlined_call_operand.vmem [shape: f32[1,96], index: 5, kind: input, shape index: {}]   ;;  %s3157_s6 = inlined_call_operand.vmem [shape: f32[32,32], index: 6, kind: input, shape index: {}]   ;;  %s3158_s7 = inlined_call_operand.hbm [shape: f32[1,32], index: 7, kind: input, shape index: {}]   ;;  %s3159_s8 = inlined_call_operand.vmem [shape: f32[32,32], index: 8, kind: input, shape index: {}]   ;;  %s3160_s9 = inlined_call_operand.hbm [shape: f32[1,32], index: 9, kind: input, shape index: {}]   ;;  %s3161_s10 = inlined_call_operand.hbm [shape: f32[32,64], index: 10, kind: input, shape index: {}]   ;;  %s3162_s11 = inlined_call_operand.hbm [shape: f32[1,64], index: 11, kind: input, shape index: {}]   ;;  %s3163_s12 = inlined_call_operand.hbm [shape: f32[32,32], index: 12, kind: input, shape index: {}]   ;;  %s3164_s13 = inlined_call_operand.vmem [shape: f32[1,32], index: 13, kind: input, shape index: {}]   ;;  %s3165_s14 = inlined_call_operand.vmem [shape: f32[6,32], index: 14, kind: input, shape index: {}]   ;;  %s3166_s15 = inlined_call_operand.hbm [shape: f32[32,64], index: 15, kind: input, shape index: {}]   ;;  %s3167_s16 = inlined_call_operand.vmem [shape: f32[1,64], index: 16, kind: input, shape index: {}]   ;;  %s3168_s17 = inlined_call_operand.vmem [shape: f32[64,32], index: 17, kind: input, shape index: {}]   ;;  %s3169_s18 = inlined_call_operand.vmem [shape: f32[1,32], index: 18, kind: input, shape index: {}]   ;;  %s3170_s19 = inlined_call_operand.hbm [shape: f32[2,8,32], index: 19, kind: output, shape index: {}]  }
   0x1   :  { %3175 = sst [smem:[#allocation27_spill]] %s3151_s0 }
   0x2   :  { %3176 = sst [smem:[#allocation28_spill]] %s3152_s1 }
   0x3   :  { %3177 = sst [smem:[#allocation29_spill]] %s3153_s2 }
   0x4   :  { %3178 = sst [smem:[#allocation30_spill]] %s3154_s3 }
   0x5   :  { %3179 = sst [smem:[#allocation31_spill]] %s3169_s18 }
   0x6   :  { %3180 = sst [smem:[#allocation32_spill]] %s3170_s19 }
   0x7   :  { %24 = vsyncpa [#allocation3], 0 }
   0x8   :  { %25 = vsyncpa [#allocation6], 0 }
   0x9   :  { %26 = vsyncpa [#allocation9], 0 }
   0xa   :  { %27 = vsyncpa [#allocation12], 0 }
   0xb   :  { %28 = vsyncpa [#allocation15], 0 }
   0xc   :  { %29 = vsyncpa [#allocation18], 0 }
   0xd   :  { %30 = vsyncpa [#allocation4], 0  ;;  %s3181_s20 = sld [smem:[#allocation28_spill]]  ;;  %s2501_s1 = smov [#allocation5]  }
   0xe   :  { %s50_s22 = sshll.u32 %s2501_s1, 4  ;;  %s3182_s24 = sld [smem:[#allocation30_spill]]  ;;  %s51_s22 = int_to_ptr.vmem [resolvable:$true] %s50_s22 }
   0xf   :  { %s3171_s3 = smov 128   ;;  %s3173_s26 = smov 8  }
  0x10   :  { %s2504_s27 = smov [#allocation8]   ;;  %s2505_s29 = smov 16  }
  0x11   :  { %s76_s28 = sshll.u32 %s2504_s27, 4  ;;  %s2506_s0 = smov 1   ;;  %s77_s28 = int_to_ptr.vmem [resolvable:$true] %s76_s28 }
  0x12   :  { %s107_s1 = sshll.u32 %s3160_s9, 4  ;;  %s2507_s2 = smov [#allocation11]   ;;  %s108_s1 = int_to_ptr.hbm [resolvable:$true] %s107_s1 }
  0x13   :  { %s48_s21 = sshll.u32 %s3181_s20, 4  ;;  %s109_s23 = sshll.u32 %s2507_s2, 4  ;;  %s49_s21 = int_to_ptr.hbm [resolvable:$true] %s48_s21  ;;  %s110_s23 = int_to_ptr.vmem [resolvable:$true] %s109_s23 }
  0x14   :  { %s74_s25 = sshll.u32 %s3182_s24, 4  ;;  %s3183_s18 = sld [smem:[#allocation27_spill]]  ;;  %s75_s25 = int_to_ptr.hbm [resolvable:$true] %s74_s25 }
  0x15   :  { %56 = dma.hbm_to_vmem [thread:$0]  %s49_s21, 256, %s51_s22, [#allocation6], %s3171_s3, %s3171_s3, %s3173_s26  }
  0x16   :  { %82 = dma.hbm_to_vmem [thread:$0]  %s75_s25, 32, %s77_s28, [#allocation9], %s2505_s29, %s2505_s29, %s2506_s0  }
  0x17   :  { %s131_s21 = sshll.u32 %s3162_s11, 4  ;;  %s2508_s22 = smov [#allocation14]   ;;  %s132_s21 = int_to_ptr.hbm [resolvable:$true] %s131_s21 }
  0x18   :  { %112 = dma.hbm_to_vmem [thread:$0]  %s108_s1, 16, %s110_s23, [#allocation12]  }
  0x19   :  { %s133_s27 = sshll.u32 %s2508_s22, 4  ;;  %s3184_s0 = sld [smem:[#allocation29_spill]]  ;;  %s134_s27 = int_to_ptr.vmem [resolvable:$true] %s133_s27 }
  0x1a   :  { %s35_s25 = sshll.u32 %s3183_s18, 4  ;;  %s2509_s20 = smov [#allocation2]   ;;  %s36_s25 = int_to_ptr.hbm [resolvable:$true] %s35_s25 }
  0x1b   :  { %136 = dma.hbm_to_vmem [thread:$0]  %s132_s21, 16, %s134_s27, [#allocation15]  }
  0x1c   :  { %s37_s2 = sshll.u32 %s2509_s20, 4  ;;  %s3185_s11 = smov 8   ;;  %s38_s2 = int_to_ptr.vmem [resolvable:$true] %s37_s2 }
  0x1d   :  { %s3186_s19 = smov 128   ;;  %s2510_s1 = smov [#allocation7]  }
  0x1e   :  { %43 = dma.hbm_to_vmem [thread:$0]  %s36_s25, 256, %s38_s2, [#allocation3], %s3186_s19, %s3186_s19, %s3185_s11  }
  0x1f   :  { %s61_s30 = sshll.u32 %s3184_s0, 4  ;;  %s63_s23 = sshll.u32 %s2510_s1, 4  ;;  %s62_s30 = int_to_ptr.hbm [resolvable:$true] %s61_s30  ;;  %s64_s23 = int_to_ptr.vmem [resolvable:$true] %s63_s23 }
  0x20   :  { %s94_s18 = sshll.u32 %s3158_s7, 4  ;;  %s117_s22 = sshll.u32 %s3161_s10, 4  ;;  %s95_s18 = int_to_ptr.hbm [resolvable:$true] %s94_s18  ;;  %s118_s22 = int_to_ptr.hbm [resolvable:$true] %s117_s22 }
  0x21   :  { %69 = dma.hbm_to_vmem [thread:$0]  %s62_s30, 256, %s64_s23, [#allocation6], %s3186_s19, %s3186_s19, %s3185_s11  }
  0x22   :  { %s2511_s27 = smov [#allocation10]   ;;  %s2512_s25 = smov [#allocation13]  }
  0x23   :  { %s96_s9 = sshll.u32 %s2511_s27, 4  ;;  %s119_s28 = sshll.u32 %s2512_s25, 4  ;;  %s97_s9 = int_to_ptr.vmem [resolvable:$true] %s96_s9  ;;  %s120_s28 = int_to_ptr.vmem [resolvable:$true] %s119_s28 }
  0x24   :  { %99 = dma.hbm_to_vmem [thread:$0]  %s95_s18, 16, %s97_s9, [#allocation9]  }
  0x25   :  { %s141_s7 = sshll.u32 %s3163_s12, 4  ;;  %s158_s10 = sshll.u32 %s3166_s15, 4  ;;  %s142_s7 = int_to_ptr.hbm [resolvable:$true] %s141_s7  ;;  %s159_s10 = int_to_ptr.hbm [resolvable:$true] %s158_s10 }
  0x26   :  { %125 = dma.hbm_to_vmem [thread:$0]  %s118_s22, 512, %s120_s28, [#allocation12], %s3186_s19, %s3186_s19, %s3185_s11  }
  0x27   :  { %s2513_s1 = smov [#allocation16]   ;;  %s2514_s24 = smov [#allocation17]  }
  0x28   :  { %s143_s23 = sshll.u32 %s2513_s1, 4  ;;  %s160_s12 = sshll.u32 %s2514_s24, 4  ;;  %s144_s23 = int_to_ptr.vmem [resolvable:$true] %s143_s23  ;;  %s161_s12 = int_to_ptr.vmem [resolvable:$true] %s160_s12 }
  0x29   :  { %149 = dma.hbm_to_vmem [thread:$0]  %s142_s7, 512, %s144_s23, [#allocation15], %s3186_s19, %s3186_s19, %s3185_s11  }
  0x2a   :  { %166 = dma.hbm_to_vmem [thread:$0]  %s159_s10, 512, %s161_s12, [#allocation18], %s3186_s19, %s3186_s19, %s3185_s11  }
  0x2b   :  { %2487 = dma.done.wait [#allocation3], 256  }
  0x2c   :  { %2488 = vsyncadd [#allocation3], 4294967040 }
  0x2d   :  { %2489 = dma.done.wait [#allocation6], 512  }
  0x2e   :  { %2490 = vsyncadd [#allocation6], 4294966784 }
  0x2f   :  { %2491 = dma.done.wait [#allocation9], 48  }
  0x30   :  { %2492 = vsyncadd [#allocation9], 4294967248 }
  0x31   :  { %2493 = dma.done.wait [#allocation12], 528  }
  0x32   :  { %2494 = vsyncadd [#allocation12], 4294966768 }
  0x33   :  { %2495 = dma.done.wait [#allocation15], 528  }
  0x34   :  { %2496 = vsyncadd [#allocation15], 4294966768 }
  0x35   :  { %2497 = dma.done.wait [#allocation18], 512  }
  0x36   :  { %2498 = vsyncadd [#allocation18], 4294966784  ;;  %v220_v0 = vld [vmem:[%s3155_s4 + $0x18] sm:$0xff]  ;;  %v219_v1 = vld [vmem:[%s3155_s4 + $0x10] sm:$0xff]  ;;  %vm225_vm0 = vcmask 261120   ;;  %s2515_s0 = smov 112  }
  0x37   :  { %244 = vmatpush.msra.mxu0 %v220_v0  ;;  %v218_v2 = vld [vmem:[%s3155_s4 + $0x8] sm:$0xff]  ;;  %v217_v3 = vld [vmem:[%s3155_s4] sm:$0xff]  ;;  %s2516_s4 = smov 120   ;;  %s2517_s20 = smov 96   ;;  %vm259_vm1 = vcmask 64512  }
  0x38   :  { %v2691_v4 = vld [vmem:[#allocation2] sm:$0xff]  ;;  %s2518_s7 = smov 80   ;;  %v2710_v8 = vld [vmem:[#allocation2 + $0x8] sm:$0xff]  ;;  %s2520_s30 = smov 56  }
  0x39   :  { %245 = vmatpush.msra.mxu0 %v219_v1  ;;  %v2130_v5 = vld [vmem:[%s3156_s5] ss:$0 sm:$0xff]  ;;  %s2519_s5 = smov 88   ;;  %s2521_s2 = smov 72  }
  0x3a   :  { %v2721_v16 = vld [vmem:[#allocation7] sm:$0xff]  ;;  %s2522_s10 = smov 64   ;;  %s2523_s1 = smov 104  }
  0x3b   :  { %246 = vmatpush.msra.mxu0 %v218_v2  ;;  %s2524_s23 = smov 48   ;;  %s2525_s24 = smov 40  }
  0x3c   :  { %s2526_s22 = smov 24  }
  0x3d   :  { %247 = vmatpush.msra.mxu0 %v217_v3 }
  0x3e   :  { %2040 = vmatmul.msk.f32.vlgmr.msra.gmra.mxu0 %vm225_vm0, %v2691_v4 }
  0x46   :  { %2041 = vmatmul.msk.f32.gmra.mxu0 %vm225_vm0, %v2710_v8 }
  0xbb   :  { %v249_v6 = vpop.f32.mrf.mxu0 }
  0xbc   :  { %v2698_v7 = vadd.f32 %v2130_v5, %v249_v6 }
  0xbe   :  { %416 = vrot.lane.b32.xlu2 %v2698_v7, %s2515_s0  ;;  %336 = vrot.lane.b32.xlu1 %v2698_v7, %s2516_s4 }
  0xbf   :  { %257 = vrot.lane.b32.xlu0 %v2698_v7, %s2517_s20 }
  0xc3   :  { %v252_v14 = vpop.f32.mrf.mxu0 }
  0xc4   :  { %v2733_v28 = vadd.f32 %v2130_v5, %v252_v14 }
  0xc6   :  { %418 = vrot.lane.b32.xlu1 %v2698_v7, %s2518_s7 }
  0xc7   :  { %338 = vrot.lane.b32.xlu0 %v2698_v7, %s2519_s5 }
 0x118   :  { %v417_v13 = vpop.permute.xlu2 %416 }
 0x130   :  { %v337_v9 = vpop.permute.xlu1 %336 }
 0x131   :  { %v258_v10 = vpop.permute.xlu0 %257 }
 0x132   :  { %2042 = vmatpush.xpose.msk.msra.mxu1 %vm259_vm1, %v258_v10 }
 0x135   :  { %2043 = vmatmul.msk.f32.vlgmr.msra.gmra.mxu1 %vm259_vm1, %v2698_v7 }
 0x138   :  { %v419_v11 = vpop.permute.xlu1 %418 }
 0x139   :  { %v339_v12 = vpop.permute.xlu0 %338  ;;  %2048 = vmatpush.xpose.msk.msrb.mxu1 %vm259_vm1, %v419_v11 }
 0x13a   :  { %2045 = vmatpush.xpose.msk.msrb.mxu0 %vm259_vm1, %v339_v12 }
 0x13d   :  { %2046 = vmatmul.msk.f32.vlgmr.msrb.gmra.mxu0 %vm259_vm1, %v337_v9  ;;  %2049 = vmatmul.msk.f32.vlgmr.msrb.gmra.mxu1 %vm259_vm1, %v417_v13 }
 0x1b2   :  { %v281_v15 = vpop.f32.mrf.mxu1 }
 0x1b3   :  { %v284_v17 = vmul.f32 0.35355338, %v281_v15 }
 0x1b5   :  { %v285_v18 = vadd.f32 %v284_v17, %v2721_v16 }
 0x1b7   :  { %v286_v19 = vsel %vm259_vm1, %v285_v18, -inf }
 0x1b8   :  { %287 = vmax.xlane.f32.xlu2 %v286_v19 }
 0x1ba   :  { %v361_v20 = vpop.f32.mrf.mxu0  ;;  %v441_v21 = vpop.f32.mrf.mxu1 }
 0x1bb   :  { %v364_v22 = vmul.f32 0.35355338, %v361_v20  ;;  %v444_v23 = vmul.f32 0.35355338, %v441_v21 }
 0x1bd   :  { %v445_v24 = vadd.f32 %v444_v23, %v2721_v16  ;;  %v365_v25 = vadd.f32 %v364_v22, %v2721_v16 }
 0x1bf   :  { %v446_v26 = vsel %vm259_vm1, %v445_v24, -inf  ;;  %v366_v27 = vsel %vm259_vm1, %v365_v25, -inf }
 0x1c0   :  { %447 = vmax.xlane.f32.xlu1 %v446_v26  ;;  %367 = vmax.xlane.f32.xlu0 %v366_v27 }
 0x1d0   :  { %390 = vrot.lane.b32.xlu2 %v2698_v7, %s2520_s30 }
 0x1d4   :  { %498 = vrot.lane.b32.xlu0 %v2698_v7, %s2521_s2 }
 0x1d8   :  { %596 = vrot.lane.b32.xlu2 %v2733_v28, %s2517_s20 }
 0x1d9   :  { %310 = vrot.lane.b32.xlu1 %v2698_v7, %s2522_s10 }
 0x1dc   :  { %496 = vrot.lane.b32.xlu0 %v2698_v7, %s2523_s1 }
 0x1e1   :  { %470 = vrot.lane.b32.xlu1 %v2698_v7, %s2524_s23 }
 0x1e4   :  { %674 = vrot.lane.b32.xlu0 %v2733_v28, %s2516_s4 }
 0x1e9   :  { %676 = vrot.lane.b32.xlu1 %v2733_v28, %s2519_s5 }
 0x1f1   :  { %836 = vrot.lane.b32.xlu1 %v2733_v28, %s2521_s2 }
 0x22b   :  { %v288_v29 = vpop.xlane.xlu2 %287 }
 0x22c   :  { %v289_v30 = vsub.f32 %v285_v18, %v288_v29 }
 0x22e   :  { %v290_v31 = vmul.f32 1.442695, %v289_v30 }
 0x230   :  { %2145 = vpow2.f32 %v290_v31 }
 0x233   :  { %v448_v32 = vpop.xlane.xlu1 %447  ;;  %v368_v34 = vpop.xlane.xlu0 %367 }
 0x234   :  { %v449_v33 = vsub.f32 %v445_v24, %v448_v32  ;;  %v369_v35 = vsub.f32 %v365_v25, %v368_v34  ;;  %v391_v44 = vpop.permute.xlu2 %390 }
 0x236   :  { %v2146_v36 = vpop.eup %2145  ;;  %v450_v37 = vmul.f32 1.442695, %v449_v33  ;;  %v370_v38 = vmul.f32 1.442695, %v369_v35 }
 0x237   :  { %v292_v39 = vsel %vm259_vm1, %v2146_v36, 0.0 }
 0x238   :  { %2147 = vpow2.f32 %v450_v37  ;;  %293 = vadd.xlane.f32.xlu2 %v292_v39  ;;  %v594_v37 = vld [vmem:[#allocation7 + $0x8] sm:$0xff] }
 0x239   :  { %2149 = vpow2.f32 %v370_v38 }
 0x23c   :  { %v597_v47 = vpop.permute.xlu2 %596 }
 0x23e   :  { %v2750_v40 = vpop.eup %2147 }
 0x23f   :  { %v2752_v41 = vpop.eup %2149  ;;  %v452_v42 = vsel %vm259_vm1, %v2750_v40, 0.0 }
 0x240   :  { %453 = vadd.xlane.f32.xlu0 %v452_v42  ;;  %v372_v43 = vsel %vm259_vm1, %v2752_v41, 0.0 }
 0x241   :  { %373 = vadd.xlane.f32.xlu2 %v372_v43 }
 0x246   :  { %v499_v48 = vpop.permute.xlu0 %498 }
 0x24b   :  { %v311_v45 = vpop.permute.xlu1 %310 }
 0x24c   :  { %331 = vmatpush.msra.mxu2 %v311_v45 }
 0x24e   :  { %411 = vmatpush.msrb.mxu2 %v391_v44  ;;  %v2765_v49 = vpop.permute.xlu0 %496 }
 0x253   :  { %v471_v46 = vpop.permute.xlu1 %470 }
 0x254   :  { %491 = vmatpush.msra.mxu3 %v471_v46  ;;  %754 = vrot.lane.b32.xlu0 %v2733_v28, %s2515_s0 }
 0x256   :  { %2054 = vmatpush.xpose.msk.msrb.mxu3 %vm259_vm1, %v597_v47  ;;  %v2767_v50 = vpop.permute.xlu0 %674 }
 0x259   :  { %756 = vrot.lane.b32.xlu2 %v2733_v28, %s2518_s7 }
 0x25b   :  { %v677_v26 = vpop.permute.xlu1 %676 }
 0x261   :  { %834 = vrot.lane.b32.xlu2 %v2733_v28, %s2523_s1 }
 0x263   :  { %v837_v30 = vpop.permute.xlu1 %836 }
 0x2ab   :  { %v294_v51 = vpop.xlane.xlu2 %293 }
 0x2ac   :  { %2151 = vrcp.f32 %v294_v51  ;;  %v306_v57 = vand.u32 2147483648, %v294_v51  ;;  %v304_v59 = vand.u32 2147483647, %v294_v51  ;;  %vm300_vm3 = vweird.f32 %v294_v51 }
 0x2ae   :  { %v307_v62 = vor.u32 1.1754944e-38, %v306_v57  ;;  %vm305_vm5 = vcmp.eq.f32.partialorder %v304_v59, 8.507059e+37 }
 0x2b2   :  { %v2152_v52 = vpop.eup %2151 }
 0x2b3   :  { %v296_v53 = vmul.f32 %v2152_v52, %v294_v51  ;;  %v454_v54 = vpop.xlane.xlu0 %453  ;;  %vm301_vm2 = vweird.f32 %v2152_v52 }
 0x2b4   :  { %v374_v55 = vpop.xlane.xlu2 %373  ;;  %2153 = vrcp.f32 %v454_v54  ;;  %vm302_vm4 = vmor %vm300_vm3, %vm301_vm2  ;;  %v466_v10 = vand.u32 2147483648, %v454_v54  ;;  %v464_v13 = vand.u32 2147483647, %v454_v54  ;;  %vm460_vm8 = vweird.f32 %v454_v54 }
 0x2b5   :  { %v297_v56 = vsub.f32 1.0, %v296_v53  ;;  %2155 = vrcp.f32 %v374_v55  ;;  %v386_v11 = vand.u32 2147483648, %v374_v55  ;;  %v384_v15 = vand.u32 2147483647, %v374_v55 }
 0x2b6   :  { %vm380_vm9 = vweird.f32 %v374_v55  ;;  %v467_v19 = vor.u32 1.1754944e-38, %v466_v10  ;;  %vm465_vm12 = vcmp.eq.f32.partialorder %v464_v13, 8.507059e+37 }
 0x2b7   :  { %v298_v58 = vmul.f32 %v2152_v52, %v297_v56  ;;  %v387_v20 = vor.u32 1.1754944e-38, %v386_v11  ;;  %vm385_vm13 = vcmp.eq.f32.partialorder %v384_v15, 8.507059e+37 }
 0x2b9   :  { %v299_v60 = vadd.f32 %v2152_v52, %v298_v58 }
 0x2ba   :  { %v2154_v61 = vpop.eup %2153 }
 0x2bb   :  { %v2156_v63 = vpop.eup %2155  ;;  %v456_v0 = vmul.f32 %v2154_v61, %v454_v54  ;;  %v303_v1 = vsel %vm302_vm4, %v2152_v52, %v299_v60  ;;  %vm461_vm6 = vweird.f32 %v2154_v61 }
 0x2bc   :  { %v376_v2 = vmul.f32 %v2156_v63, %v374_v55  ;;  %v308_v3 = vsel %vm305_vm5, %v307_v62, %v303_v1  ;;  %vm381_vm7 = vweird.f32 %v2156_v63  ;;  %vm462_vm10 = vmor %vm460_vm8, %vm461_vm6  ;;  %v757_v29 = vpop.permute.xlu2 %756 }
 0x2bd   :  { %v457_v5 = vsub.f32 1.0, %v456_v0  ;;  %v309_v6 = vmul.f32 %v2146_v36, %v308_v3  ;;  %vm382_vm11 = vmor %vm380_vm9, %vm381_vm7 }
 0x2be   :  { %v377_v9 = vsub.f32 1.0, %v376_v2 }
 0x2bf   :  { %v458_v12 = vmul.f32 %v2154_v61, %v457_v5  ;;  %2044 = vmatmul.msk.f32.vlgmr.msra.gmra.mxu2 %vm259_vm1, %v309_v6 }
 0x2c0   :  { %v378_v14 = vmul.f32 %v2156_v63, %v377_v9  ;;  %2051 = vmatpush.xpose.msk.msra.mxu2 %vm259_vm1, %v499_v48 }
 0x2c1   :  { %v459_v17 = vadd.f32 %v2154_v61, %v458_v12 }
 0x2c2   :  { %v379_v18 = vadd.f32 %v2156_v63, %v378_v14 }
 0x2c3   :  { %v463_v21 = vsel %vm462_vm10, %v2154_v61, %v459_v17 }
 0x2c4   :  { %v383_v22 = vsel %vm382_vm11, %v2156_v63, %v379_v18  ;;  %v468_v23 = vsel %vm465_vm12, %v467_v19, %v463_v21  ;;  %v835_v32 = vpop.permute.xlu2 %834 }
 0x2c5   :  { %v388_v24 = vsel %vm385_vm13, %v387_v20, %v383_v22  ;;  %v469_v25 = vmul.f32 %v2750_v40, %v468_v23 }
 0x2c6   :  { %v389_v27 = vmul.f32 %v2752_v41, %v388_v24  ;;  %v755_v31 = vpop.permute.xlu0 %754 }
 0x2c7   :  { %2050 = vmatmul.msk.f32.vlgmr.msra.gmra.mxu3 %vm259_vm1, %v469_v25 }
 0x2c8   :  { %2047 = vmatmul.msk.f32.vlgmr.msrb.gmra.mxu2 %vm259_vm1, %v389_v27  ;;  %2060 = vmatpush.xpose.msk.msra.mxu3 %vm259_vm1, %v757_v29 }
 0x2c9   :  { %2057 = vmatpush.xpose.msk.msrb.mxu2 %vm259_vm1, %v677_v26 }
 0x2cf   :  { %2055 = vmatmul.msk.f32.vlgmr.msrb.gmra.mxu3 %vm259_vm1, %v2733_v28 }
 0x2d0   :  { %2052 = vmatmul.msk.f32.vlgmr.msra.gmra.mxu2 %vm259_vm1, %v2765_v49 }
 0x2d1   :  { %2063 = vmatpush.xpose.msk.msra.mxu2 %vm259_vm1, %v837_v30 }
 0x2d7   :  { %2061 = vmatmul.msk.f32.vlgmr.msra.gmra.mxu3 %vm259_vm1, %v755_v31 }
 0x2d8   :  { %2058 = vmatmul.msk.f32.vlgmr.msrb.gmra.mxu2 %vm259_vm1, %v2767_v50 }
 0x2e0   :  { %2064 = vmatmul.msk.f32.vlgmr.msra.gmra.mxu2 %vm259_vm1, %v835_v32 }
 0x342   :  { %v2786_v33 = vpop.f32.mrf.mxu2 }
 0x34a   :  { %v2788_v34 = vpop.f32.mrf.mxu3 }
 0x34b   :  { %v2790_v35 = vpop.f32.mrf.mxu2 }
 0x352   :  { %v619_v36 = vpop.f32.mrf.mxu3 }
 0x353   :  { %v521_v38 = vpop.f32.mrf.mxu2  ;;  %v622_v39 = vmul.f32 0.35355338, %v619_v36 }
 0x354   :  { %v524_v40 = vmul.f32 0.35355338, %v521_v38 }
 0x355   :  { %v623_v41 = vadd.f32 %v622_v39, %v594_v37 }
 0x356   :  { %v525_v42 = vadd.f32 %v524_v40, %v2721_v16 }
 0x357   :  { %v624_v43 = vsel %vm259_vm1, %v623_v41, -inf }
 0x358   :  { %v526_v44 = vsel %vm259_vm1, %v525_v42, -inf  ;;  %625 = vmax.xlane.f32.xlu0 %v624_v43 }
 0x359   :  { %527 = vmax.xlane.f32.xlu1 %v526_v44 }
 0x35a   :  { %v779_v45 = vpop.f32.mrf.mxu3 }
 0x35b   :  { %v699_v46 = vpop.f32.mrf.mxu2  ;;  %v782_v47 = vmul.f32 0.35355338, %v779_v45 }
 0x35c   :  { %v702_v48 = vmul.f32 0.35355338, %v699_v46 }
 0x35d   :  { %v783_v49 = vadd.f32 %v782_v47, %v594_v37 }
 0x35e   :  { %v703_v50 = vadd.f32 %v702_v48, %v594_v37 }
 0x35f   :  { %v784_v51 = vsel %vm259_vm1, %v783_v49, -inf }
 0x360   :  { %v704_v52 = vsel %vm259_vm1, %v703_v50, -inf }
 0x361   :  { %705 = vmax.xlane.f32.xlu2 %v704_v52  ;;  %785 = vmax.xlane.f32.xlu1 %v784_v51 }
 0x363   :  { %v859_v53 = vpop.f32.mrf.mxu2 }
 0x364   :  { %v862_v16 = vmul.f32 0.35355338, %v859_v53 }
 0x366   :  { %v863_v54 = vadd.f32 %v862_v16, %v594_v37 }
 0x368   :  { %v864_v55 = vsel %vm259_vm1, %v863_v54, -inf }
 0x369   :  { %865 = vmax.xlane.f32.xlu0 %v864_v55 }
 0x379   :  { %648 = vrot.lane.b32.xlu2 %v2733_v28, %s2522_s10 }
 0x37d   :  { %550 = vrot.lane.b32.xlu0 %v2698_v7, %s2525_s24 }
 0x3cb   :  { %v626_v56 = vpop.xlane.xlu0 %625 }
 0x3cc   :  { %v528_v57 = vpop.xlane.xlu1 %527  ;;  %v627_v58 = vsub.f32 %v623_v41, %v626_v56 }
 0x3cd   :  { %v529_v59 = vsub.f32 %v525_v42, %v528_v57 }
 0x3ce   :  { %v628_v60 = vmul.f32 1.442695, %v627_v58 }
 0x3cf   :  { %v530_v61 = vmul.f32 1.442695, %v529_v59 }
 0x3d0   :  { %2157 = vpow2.f32 %v628_v60 }
 0x3d1   :  { %2159 = vpow2.f32 %v530_v61 }
 0x3d4   :  { %v706_v62 = vpop.xlane.xlu2 %705  ;;  %v786_v63 = vpop.xlane.xlu1 %785 }
 0x3d5   :  { %v707_v0 = vsub.f32 %v703_v50, %v706_v62  ;;  %v787_v1 = vsub.f32 %v783_v49, %v786_v63 }
 0x3d6   :  { %v2802_v2 = vpop.eup %2157 }
 0x3d7   :  { %v2804_v3 = vpop.eup %2159  ;;  %v708_v5 = vmul.f32 1.442695, %v707_v0  ;;  %v788_v6 = vmul.f32 1.442695, %v787_v1  ;;  %v630_v7 = vsel %vm259_vm1, %v2802_v2, 0.0 }
 0x3d8   :  { %v532_v9 = vsel %vm259_vm1, %v2804_v3, 0.0  ;;  %631 = vadd.xlane.f32.xlu1 %v630_v7 }
 0x3d9   :  { %2161 = vpow2.f32 %v708_v5  ;;  %533 = vadd.xlane.f32.xlu2 %v532_v9 }
 0x3da   :  { %2163 = vpow2.f32 %v788_v6 }
 0x3dc   :  { %v649_v10 = vpop.permute.xlu2 %648  ;;  %v866_v11 = vpop.xlane.xlu0 %865 }
 0x3dd   :  { %v867_v12 = vsub.f32 %v863_v54, %v866_v11  ;;  %669 = vmatpush.msra.mxu0 %v649_v10 }
 0x3df   :  { %v2810_v13 = vpop.eup %2161  ;;  %v868_v14 = vmul.f32 1.442695, %v867_v12 }
 0x3e0   :  { %v2812_v15 = vpop.eup %2163  ;;  %v710_v17 = vsel %vm259_vm1, %v2810_v13, 0.0 }
 0x3e1   :  { %2165 = vpow2.f32 %v868_v14  ;;  %711 = vadd.xlane.f32.xlu0 %v710_v17  ;;  %v790_v18 = vsel %vm259_vm1, %v2812_v15, 0.0 }
 0x3e2   :  { %791 = vadd.xlane.f32.xlu2 %v790_v18 }
 0x3e7   :  { %v2818_v19 = vpop.eup %2165 }
 0x3e8   :  { %v870_v20 = vsel %vm259_vm1, %v2818_v19, 0.0 }
 0x3e9   :  { %871 = vadd.xlane.f32.xlu1 %v870_v20 }
 0x3ef   :  { %v551_v21 = vpop.permute.xlu0 %550 }
 0x3f0   :  { %571 = vmatpush.msra.mxu1 %v551_v21 }
 0x3f5   :  { %808 = vrot.lane.b32.xlu0 %v2733_v28, %s2524_s23 }
 0x3fa   :  { %888 = vrot.lane.b32.xlu2 %v2733_v28, %s2525_s24 }
 0x3fd   :  { %577 = vrot.lane.b32.xlu0 %v2790_v35, %s3185_s11 }
 0x402   :  { %728 = vrot.lane.b32.xlu1 %v2733_v28, %s2520_s30 }
 0x40a   :  { %581 = vrot.lane.b32.xlu1 %v2788_v34, %s2505_s29 }
 0x44b   :  { %v632_v22 = vpop.xlane.xlu1 %631 }
 0x44c   :  { %v534_v23 = vpop.xlane.xlu2 %533  ;;  %2167 = vrcp.f32 %v632_v22  ;;  %v644_v35 = vand.u32 2147483648, %v632_v22  ;;  %v642_v34 = vand.u32 2147483647, %v632_v22  ;;  %vm638_vm2 = vweird.f32 %v632_v22 }
 0x44d   :  { %2169 = vrcp.f32 %v534_v23  ;;  %v546_v28 = vand.u32 2147483648, %v534_v23  ;;  %v544_v38 = vand.u32 2147483647, %v534_v23  ;;  %vm540_vm3 = vweird.f32 %v534_v23 }
 0x44e   :  { %v645_v41 = vor.u32 1.1754944e-38, %v644_v35  ;;  %vm643_vm6 = vcmp.eq.f32.partialorder %v642_v34, 8.507059e+37  ;;  %v929_v35 = vld [vmem:[%s3157_s6] sm:$0xff] }
 0x44f   :  { %v547_v43 = vor.u32 1.1754944e-38, %v546_v28  ;;  %vm545_vm7 = vcmp.eq.f32.partialorder %v544_v38, 8.507059e+37 }
 0x452   :  { %v2168_v24 = vpop.eup %2167 }
 0x453   :  { %v2170_v25 = vpop.eup %2169  ;;  %v634_v26 = vmul.f32 %v2168_v24, %v632_v22  ;;  %vm639_vm14 = vweird.f32 %v2168_v24 }
 0x454   :  { %v536_v27 = vmul.f32 %v2170_v25, %v534_v23  ;;  %v2832_v29 = vpop.xlane.xlu0 %711  ;;  %vm541_vm15 = vweird.f32 %v2170_v25  ;;  %vm640_vm4 = vmor %vm638_vm2, %vm639_vm14 }
 0x455   :  { %v635_v30 = vsub.f32 1.0, %v634_v26  ;;  %v792_v31 = vpop.xlane.xlu2 %791  ;;  %2171 = vrcp.f32 %v2832_v29  ;;  %vm542_vm5 = vmor %vm540_vm3, %vm541_vm15  ;;  %v724_v6 = vand.u32 2147483648, %v2832_v29  ;;  %vm718_vm13 = vweird.f32 %v2832_v29  ;;  %v932_v26 = vld [vmem:[%s3157_s6 + $0x18] sm:$0xff] }
 0x456   :  { %v537_v32 = vsub.f32 1.0, %v536_v27  ;;  %2173 = vrcp.f32 %v792_v31  ;;  %v804_v54 = vand.u32 2147483648, %v792_v31  ;;  %v802_v56 = vand.u32 2147483647, %v792_v31  ;;  %955 = vmatpush.msrb.mxu3 %v932_v26  ;;  %v2132_v26 = vld [vmem:[%s3165_s14] ss:$0 sm:$0xff] }
 0x457   :  { %v636_v36 = vmul.f32 %v2168_v24, %v635_v30  ;;  %vm798_vm9 = vweird.f32 %v792_v31  ;;  %v722_v7 = vand.u32 2147483647, %v2832_v29  ;;  %v725_v11 = vor.u32 1.1754944e-38, %v724_v6  ;;  %v930_v30 = vld [vmem:[%s3157_s6 + $0x8] sm:$0xff] }
 0x458   :  { %v538_v37 = vmul.f32 %v2170_v25, %v537_v32  ;;  %v805_v60 = vor.u32 1.1754944e-38, %v804_v54  ;;  %vm803_vm11 = vcmp.eq.f32.partialorder %v802_v56, 8.507059e+37  ;;  %v1068_v54 = vld [vmem:[#allocation13] sm:$0xff] }
 0x459   :  { %v637_v39 = vadd.f32 %v2168_v24, %v636_v36  ;;  %vm723_vm15 = vcmp.eq.f32.partialorder %v722_v7, 8.507059e+37  ;;  %v1031_v7 = vld [vmem:[%s3159_s8] sm:$0xff] }
 0x45a   :  { %v539_v40 = vadd.f32 %v2170_v25, %v538_v37 }
 0x45b   :  { %v2172_v42 = vpop.eup %2171  ;;  %v641_v44 = vsel %vm640_vm4, %v2168_v24, %v637_v39 }
 0x45c   :  { %v2174_v45 = vpop.eup %2173  ;;  %v543_v46 = vsel %vm542_vm5, %v2170_v25, %v539_v40  ;;  %v646_v47 = vsel %vm643_vm6, %v645_v41, %v641_v44  ;;  %v872_v48 = vpop.xlane.xlu1 %871  ;;  %v714_v51 = vmul.f32 %v2172_v42, %v2832_v29  ;;  %vm719_vm12 = vweird.f32 %v2172_v42 }
 0x45d   :  { %v548_v49 = vsel %vm545_vm7, %v547_v43, %v543_v46  ;;  %v794_v50 = vmul.f32 %v2174_v45, %v792_v31  ;;  %2175 = vrcp.f32 %v872_v48  ;;  %v647_v16 = vmul.f32 %v2802_v2, %v646_v47  ;;  %vm720_vm14 = vmor %vm718_vm13, %vm719_vm12  ;;  %v889_v21 = vpop.permute.xlu2 %888  ;;  %v2131_v46 = vld [vmem:[#allocation10] ss:$0 sm:$0xff] }
 0x45e   :  { %v549_v53 = vmul.f32 %v2804_v3, %v548_v49  ;;  %vm799_vm8 = vweird.f32 %v2174_v45  ;;  %v715_v57 = vsub.f32 1.0, %v714_v51  ;;  %vm878_vm3 = vweird.f32 %v872_v48 }
 0x45f   :  { %v795_v52 = vsub.f32 1.0, %v794_v50  ;;  %2056 = vmatmul.msk.f32.vlgmr.msra.gmra.mxu0 %vm259_vm1, %v647_v16  ;;  %vm800_vm10 = vmor %vm798_vm9, %vm799_vm8  ;;  %v882_v17 = vand.u32 2147483647, %v872_v48  ;;  %vm589_vm6 = vcmask 130048   ;;  %vm591_vm7 = vcmask 195584   ;;  %v1069_v16 = vld [vmem:[#allocation13 + $0x8] sm:$0xff] }
 0x460   :  { %2053 = vmatmul.msk.f32.vlgmr.msra.gmra.mxu1 %vm259_vm1, %v549_v53  ;;  %v716_v63 = vmul.f32 %v2172_v42, %v715_v57  ;;  %v1070_v53 = vld [vmem:[#allocation13 + $0x10] sm:$0xff] }
 0x461   :  { %v796_v55 = vmul.f32 %v2174_v45, %v795_v52  ;;  %vm883_vm5 = vcmp.eq.f32.partialorder %v882_v17, 8.507059e+37  ;;  %v1071_v52 = vld [vmem:[#allocation13 + $0x18] sm:$0xff] }
 0x462   :  { %v717_v3 = vadd.f32 %v2172_v42, %v716_v63  ;;  %1094 = vmatpush.msrb.mxu2 %v1071_v52  ;;  %v2135_v52 = vld [vmem:[#allocation11] ss:$0 sm:$0xff] }
 0x463   :  { %v2176_v58 = vpop.eup %2175  ;;  %v797_v59 = vadd.f32 %v2174_v45, %v796_v55  ;;  %v215_v55 = vld [vmem:[#allocation5] sm:$0xff] }
 0x464   :  { %v874_v0 = vmul.f32 %v2176_v58, %v872_v48  ;;  %v721_v9 = vsel %vm720_vm14, %v2172_v42, %v717_v3  ;;  %vm879_vm2 = vweird.f32 %v2176_v58  ;;  %1095 = vmatpush.msrb.mxu2 %v1070_v53  ;;  %v1033_v3 = vld [vmem:[%s3159_s8 + $0x10] sm:$0xff] }
 0x465   :  { %v801_v61 = vsel %vm800_vm10, %v2174_v45, %v797_v59  ;;  %v726_v12 = vsel %vm723_vm15, %v725_v11, %v721_v9  ;;  %vm880_vm4 = vmor %vm878_vm3, %vm879_vm2 }
 0x466   :  { %v806_v62 = vsel %vm803_vm11, %v805_v60, %v801_v61  ;;  %v875_v5 = vsub.f32 1.0, %v874_v0  ;;  %v727_v20 = vmul.f32 %v2810_v13, %v726_v12  ;;  %v931_v13 = vld [vmem:[%s3157_s6 + $0x10] sm:$0xff]  ;;  %1096 = vmatpush.msrb.mxu2 %v1069_v16  ;;  %v2527_v61 = vmov 32.0  }
 0x467   :  { %v809_v1 = vpop.permute.xlu0 %808  ;;  %v807_v2 = vmul.f32 %v2812_v15, %v806_v62  ;;  %v884_v15 = vand.u32 2147483648, %v872_v48  ;;  %956 = vmatpush.msrb.mxu3 %v931_v13  ;;  %2177 = vrcp.f32 %v2527_v61 }
 0x468   :  { %829 = vmatpush.msrb.mxu0 %v809_v1  ;;  %v876_v10 = vmul.f32 %v2176_v58, %v875_v5  ;;  %1097 = vmatpush.msrb.mxu2 %v1068_v54  ;;  %v1032_v5 = vld [vmem:[%s3159_s8 + $0x8] sm:$0xff] }
 0x469   :  { %2062 = vmatmul.msk.f32.vlgmr.msrb.gmra.mxu0 %vm259_vm1, %v807_v2  ;;  %v885_v23 = vor.u32 1.1754944e-38, %v884_v15  ;;  %957 = vmatpush.msrb.mxu3 %v930_v30 }
 0x46a   :  { %v877_v14 = vadd.f32 %v2176_v58, %v876_v10  ;;  %2070 = vmatmul.msk.f32.vlgmr.msrb.gmra.mxu2 %vm225_vm0, %v215_v55 }
 0x46b   :  { %958 = vmatpush.msrb.mxu3 %v929_v35 }
 0x46c   :  { %v881_v22 = vsel %vm880_vm4, %v2176_v58, %v877_v14 }
 0x46d   :  { %v886_v24 = vsel %vm883_vm5, %v885_v23, %v881_v22  ;;  %v2178_v62 = vpop.eup %2177 }
 0x46e   :  { %v887_v25 = vmul.f32 %v2818_v19, %v886_v24  ;;  %v977_v63 = vmul.f32 32.0, %v2178_v62  ;;  %vm981_vm8 = vweird.f32 %v2178_v62 }
 0x46f   :  { %v578_v28 = vpop.permute.xlu0 %577 }
 0x470   :  { %v588_v34 = vsel %vm259_vm1, %v2786_v33, %v578_v28  ;;  %v978_v0 = vsub.f32 1.0, %v977_v63  ;;  %v2134_v28 = vld [vmem:[#allocation14] ss:$0 sm:$0xff] }
 0x472   :  { %v979_v1 = vmul.f32 %v2178_v62, %v978_v0 }
 0x474   :  { %v729_v18 = vpop.permute.xlu1 %728  ;;  %v980_v2 = vadd.f32 %v2178_v62, %v979_v1  ;;  %v2136_v1 = vld [vmem:[#allocation8] ss:$0 sm:$0xff] }
 0x475   :  { %749 = vmatpush.msrb.mxu1 %v729_v18 }
 0x476   :  { %2059 = vmatmul.msk.f32.vlgmr.msrb.gmra.mxu1 %vm259_vm1, %v727_v20  ;;  %v2895_v6 = vsel %vm981_vm8, %v2178_v62, %v980_v2 }
 0x477   :  { %909 = vmatpush.msra.mxu1 %v889_v21 }
 0x47c   :  { %v582_v36 = vpop.permute.xlu1 %581 }
 0x47d   :  { %v590_v37 = vsel %vm589_vm6, %v588_v34, %v582_v36 }
 0x47e   :  { %2065 = vmatmul.msk.f32.vlgmr.msra.gmra.mxu1 %vm259_vm1, %v887_v25 }
 0x4dc   :  { %v671_v29 = vpop.f32.mrf.mxu0 }
 0x4dd   :  { %v573_v27 = vpop.f32.mrf.mxu1 }
 0x4de   :  { %585 = vrot.lane.b32.xlu2 %v573_v27, %s2526_s22 }
 0x4e6   :  { %v831_v19 = vpop.f32.mrf.mxu0 }
 0x4e7   :  { %919 = vrot.lane.b32.xlu1 %v831_v19, %s2505_s29 }
 0x4ed   :  { %v1099_v36 = vpop.f32.mrf.mxu2 }
 0x4f3   :  { %v751_v31 = vpop.f32.mrf.mxu1 }
 0x4f4   :  { %915 = vrot.lane.b32.xlu0 %v751_v31, %s3185_s11  ;;  %v216_v31 = vld [vmem:[#allocation5 + $0x8] sm:$0xff] }
 0x4f5   :  { %2071 = vmatmul.msk.f32.gmra.mxu2 %vm225_vm0, %v216_v31 }
 0x4fb   :  { %v911_v32 = vpop.f32.mrf.mxu1 }
 0x4fc   :  { %923 = vrot.lane.b32.xlu2 %v911_v32, %s2526_s22 }
 0x538   :  { %v586_v38 = vpop.permute.xlu2 %585 }
 0x539   :  { %v592_v39 = vsel %vm591_vm7, %v590_v37, %v586_v38 }
 0x53a   :  { %2066 = vmatmul.msk.f32.vlgmr.msrb.gmra.mxu3 %vm225_vm0, %v592_v39  ;;  %v2915_v39 = vadd.f32 %v2134_v28, %v1099_v36 }
 0x53c   :  { %2072 = vmatpush.xpose.msk.msrb.mxu1 %vm259_vm1, %v2915_v39 }
 0x556   :  { %v924_v43 = vpop.permute.xlu2 %923 }
 0x559   :  { %v920_v41 = vpop.permute.xlu1 %919 }
 0x566   :  { %v916_v40 = vpop.permute.xlu0 %915 }
 0x567   :  { %v926_v42 = vsel %vm259_vm1, %v671_v29, %v916_v40  ;;  %v2133_v29 = vld [vmem:[%s3165_s14 + $0x1] ss:$0 sm:$0xff] }
 0x568   :  { %v927_v44 = vsel %vm589_vm6, %v926_v42, %v920_v41 }
 0x569   :  { %v928_v45 = vsel %vm591_vm7, %v927_v44, %v924_v43 }
 0x56a   :  { %2067 = vmatmul.msk.f32.gmra.mxu3 %vm225_vm0, %v928_v45 }
 0x578   :  { %v1102_v54 = vpop.f32.mrf.mxu2 }
 0x579   :  { %v2933_v55 = vadd.f32 %v2134_v28, %v1102_v54 }
 0x5bd   :  { %v960_v33 = vpop.f32.mrf.mxu3 }
 0x5be   :  { %v961_v47 = vadd.f32 %v2131_v46, %v960_v33 }
 0x5c0   :  { %v966_v48 = vadd.f32 %v961_v47, %v2691_v4 }
 0x5c2   :  { %v970_v49 = vsel %vm225_vm0, %v966_v48, 0.0  ;;  %v985_v50 = vmul.f32 %v966_v48, %v966_v48 }
 0x5c3   :  { %971 = vadd.xlane.f32.xlu0 %v970_v49 }
 0x5c4   :  { %v987_v51 = vsel %vm225_vm0, %v985_v50, 0.0 }
 0x5c5   :  { %988 = vadd.xlane.f32.xlu1 %v987_v51 }
 0x5de   :  { %1189 = vrot.lane.b32.xlu1 %v2915_v39, %s2516_s4 }
 0x5e6   :  { %1349 = vrot.lane.b32.xlu1 %v2915_v39, %s2523_s1 }
 0x5ed   :  { %v963_v56 = vpop.f32.mrf.mxu3 }
 0x5ee   :  { %v964_v4 = vadd.f32 %v2131_v46, %v963_v56  ;;  %1527 = vrot.lane.b32.xlu1 %v2933_v55, %s2516_s4 }
 0x5f0   :  { %v2879_v57 = vadd.f32 %v964_v4, %v2710_v8  ;;  %v1034_v8 = vld [vmem:[%s3159_s8 + $0x18] sm:$0xff] }
 0x5f1   :  { %1057 = vmatpush.msra.mxu0 %v1034_v8 }
 0x5f2   :  { %v973_v58 = vsel %vm225_vm0, %v2879_v57, 0.0  ;;  %v986_v59 = vmul.f32 %v2879_v57, %v2879_v57 }
 0x5f3   :  { %974 = vadd.xlane.f32.xlu2 %v973_v58  ;;  %1058 = vmatpush.msra.mxu0 %v1033_v3 }
 0x5f4   :  { %v990_v60 = vsel %vm225_vm0, %v986_v59, 0.0 }
 0x5f5   :  { %991 = vadd.xlane.f32.xlu0 %v990_v60  ;;  %1059 = vmatpush.msra.mxu0 %v1032_v5 }
 0x5f6   :  { %1687 = vrot.lane.b32.xlu1 %v2933_v55, %s2523_s1 }
 0x5f7   :  { %1060 = vmatpush.msra.mxu0 %v1031_v7 }
 0x609   :  { %1269 = vrot.lane.b32.xlu0 %v2915_v39, %s2515_s0 }
 0x636   :  { %v972_v9 = vpop.xlane.xlu0 %971 }
 0x637   :  { %v983_v10 = vmul.f32 %v2895_v6, %v972_v9 }
 0x638   :  { %v989_v11 = vpop.xlane.xlu1 %988 }
 0x639   :  { %v995_v12 = vmul.f32 %v983_v10, %v983_v10  ;;  %v993_v14 = vmul.f32 %v989_v11, %v2895_v6  ;;  %v999_v25 = vsub.f32 %v966_v48, %v983_v10 }
 0x63b   :  { %v997_v15 = vsub.f32 %v993_v14, %v995_v12 }
 0x63d   :  { %v1001_v17 = vadd.f32 1e-05, %v997_v15 }
 0x63f   :  { %2179 = vrsqrt.f32 %v1001_v17  ;;  %vm1009_vm10 = vweird.f32 %v1001_v17 }
 0x645   :  { %v2180_v18 = vpop.eup %2179 }
 0x646   :  { %v1004_v20 = vmul.f32 %v2180_v18, %v1001_v17  ;;  %vm1010_vm9 = vweird.f32 %v2180_v18 }
 0x647   :  { %vm1011_vm11 = vmor %vm1009_vm10, %vm1010_vm9 }
 0x648   :  { %v1005_v21 = vmul.f32 %v2180_v18, %v1004_v20 }
 0x64a   :  { %v1006_v22 = vmul.f32 0.5, %v1005_v21 }
 0x64c   :  { %v1007_v23 = vsub.f32 1.5, %v1006_v22 }
 0x64e   :  { %v1008_v24 = vmul.f32 %v2180_v18, %v1007_v23 }
 0x650   :  { %v1012_v13 = vsel %vm1011_vm11, %v2180_v18, %v1008_v24  ;;  %v1190_v4 = vpop.permute.xlu1 %1189 }
 0x651   :  { %v1023_v27 = vmul.f32 %v1012_v13, %v999_v25  ;;  %2075 = vmatpush.xpose.msk.msra.mxu3 %vm259_vm1, %v1190_v4 }
 0x653   :  { %v1026_v30 = vmul.f32 %v2132_v26, %v1023_v27 }
 0x655   :  { %v2908_v19 = vadd.f32 %v2133_v29, %v1026_v30  ;;  %v2137_v30 = vld [vmem:[#allocation8 + $0x1] ss:$0 sm:$0xff] }
 0x657   :  { %2068 = vmatmul.msk.f32.vlgmr.msra.gmra.mxu0 %vm225_vm0, %v2908_v19 }
 0x658   :  { %v1350_v59 = vpop.permute.xlu1 %1349 }
 0x659   :  { %2081 = vmatpush.xpose.msk.msrb.mxu3 %vm259_vm1, %v1350_v59 }
 0x660   :  { %v1528_v0 = vpop.permute.xlu1 %1527 }
 0x666   :  { %v975_v32 = vpop.xlane.xlu2 %974 }
 0x667   :  { %v984_v35 = vmul.f32 %v2895_v6, %v975_v32 }
 0x668   :  { %v992_v34 = vpop.xlane.xlu0 %991  ;;  %v1688_v3 = vpop.permute.xlu1 %1687 }
 0x669   :  { %v996_v37 = vmul.f32 %v984_v35, %v984_v35  ;;  %v994_v38 = vmul.f32 %v992_v34, %v2895_v6  ;;  %v1000_v47 = vsub.f32 %v2879_v57, %v984_v35 }
 0x66b   :  { %v998_v40 = vsub.f32 %v994_v38, %v996_v37 }
 0x66d   :  { %v1002_v41 = vadd.f32 1e-05, %v998_v40 }
 0x66f   :  { %2181 = vrsqrt.f32 %v1002_v41  ;;  %vm1019_vm13 = vweird.f32 %v1002_v41 }
 0x675   :  { %v2182_v42 = vpop.eup %2181 }
 0x676   :  { %v1014_v43 = vmul.f32 %v2182_v42, %v1002_v41  ;;  %vm1020_vm12 = vweird.f32 %v2182_v42 }
 0x677   :  { %vm1021_vm14 = vmor %vm1019_vm13, %vm1020_vm12 }
 0x678   :  { %v1015_v44 = vmul.f32 %v2182_v42, %v1014_v43 }
 0x67a   :  { %v1016_v45 = vmul.f32 0.5, %v1015_v44 }
 0x67b   :  { %v1270_v56 = vpop.permute.xlu0 %1269 }
 0x67c   :  { %v1017_v46 = vsub.f32 1.5, %v1016_v45  ;;  %2078 = vmatpush.xpose.msk.msra.mxu2 %vm259_vm1, %v1270_v56 }
 0x67e   :  { %v1018_v33 = vmul.f32 %v2182_v42, %v1017_v46 }
 0x680   :  { %v1022_v48 = vsel %vm1021_vm14, %v2182_v42, %v1018_v33  ;;  %2084 = vmatpush.xpose.msk.msrb.mxu2 %vm259_vm1, %v2933_v55 }
 0x681   :  { %v1024_v49 = vmul.f32 %v1022_v48, %v1000_v47 }
 0x683   :  { %v1027_v50 = vmul.f32 %v2132_v26, %v1024_v49 }
 0x685   :  { %v2926_v51 = vadd.f32 %v2133_v29, %v1027_v50 }
 0x687   :  { %2069 = vmatmul.msk.f32.gmra.mxu0 %vm225_vm0, %v2926_v51 }
 0x6d4   :  { %v1062_v53 = vpop.f32.mrf.mxu0 }
 0x6d5   :  { %v1063_v16 = vadd.f32 %v2135_v52, %v1062_v53 }
 0x6d7   :  { %1267 = vrot.lane.b32.xlu0 %v1063_v16, %s2515_s0  ;;  %1187 = vrot.lane.b32.xlu2 %v1063_v16, %s2516_s4 }
 0x6d8   :  { %2073 = vmatmul.msk.f32.vlgmr.msrb.gmra.mxu1 %vm259_vm1, %v1063_v16 }
 0x6df   :  { %1347 = vrot.lane.b32.xlu2 %v1063_v16, %s2523_s1 }
 0x6e7   :  { %1607 = vrot.lane.b32.xlu2 %v2933_v55, %s2515_s0 }
 0x704   :  { %v1065_v57 = vpop.f32.mrf.mxu0 }
 0x705   :  { %v1066_v58 = vadd.f32 %v2135_v52, %v1065_v57 }
 0x707   :  { %1685 = vrot.lane.b32.xlu2 %v1066_v58, %s2523_s1  ;;  %1525 = vrot.lane.b32.xlu0 %v1066_v58, %s2516_s4  ;;  %s2528_s4 = smov [#allocation19]  }
 0x70f   :  { %1605 = vrot.lane.b32.xlu0 %v1066_v58, %s2515_s0 }
 0x731   :  { %v1188_v60 = vpop.permute.xlu2 %1187 }
 0x732   :  { %2076 = vmatmul.msk.f32.vlgmr.msra.gmra.mxu3 %vm259_vm1, %v1188_v60 }
 0x733   :  { %2087 = vmatpush.xpose.msk.msra.mxu3 %vm259_vm1, %v1528_v0 }
 0x739   :  { %v1348_v61 = vpop.permute.xlu2 %1347 }
 0x73a   :  { %2082 = vmatmul.msk.f32.vlgmr.msrb.gmra.mxu3 %vm259_vm1, %v1348_v61 }
 0x73b   :  { %2093 = vmatpush.xpose.msk.msrb.mxu3 %vm259_vm1, %v1688_v3 }
 0x741   :  { %v1608_v63 = vpop.permute.xlu2 %1607 }
 0x749   :  { %v1268_v62 = vpop.permute.xlu0 %1267 }
 0x74a   :  { %2079 = vmatmul.msk.f32.vlgmr.msra.gmra.mxu2 %vm259_vm1, %v1268_v62 }
 0x74b   :  { %2090 = vmatpush.xpose.msk.msra.mxu2 %vm259_vm1, %v1608_v63 }
 0x752   :  { %2085 = vmatmul.msk.f32.vlgmr.msrb.gmra.mxu2 %vm259_vm1, %v1066_v58 }
 0x755   :  { %v1129_v2 = vpop.f32.mrf.mxu1 }
 0x756   :  { %v1132_v8 = vmul.f32 0.35355338, %v1129_v2 }
 0x758   :  { %v1136_v5 = vadd.f32 %v2136_v1, %v1132_v8 }
 0x75a   :  { %v1137_v7 = vsel %vm259_vm1, %v1136_v5, -inf }
 0x75b   :  { %1138 = vmax.xlane.f32.xlu1 %v1137_v7 }
 0x761   :  { %v1686_v10 = vpop.permute.xlu2 %1685 }
 0x779   :  { %v1526_v9 = vpop.permute.xlu0 %1525 }
 0x77a   :  { %2088 = vmatmul.msk.f32.vlgmr.msra.gmra.mxu3 %vm259_vm1, %v1526_v9 }
 0x781   :  { %v1606_v11 = vpop.permute.xlu0 %1605 }
 0x782   :  { %2091 = vmatmul.msk.f32.vlgmr.msra.gmra.mxu2 %vm259_vm1, %v1606_v11  ;;  %2094 = vmatmul.msk.f32.vlgmr.msrb.gmra.mxu3 %vm259_vm1, %v1686_v10 }
 0x7b5   :  { %v1212_v12 = vpop.f32.mrf.mxu3 }
 0x7b6   :  { %v1215_v14 = vmul.f32 0.35355338, %v1212_v12 }
 0x7b8   :  { %v1216_v15 = vadd.f32 %v2136_v1, %v1215_v14 }
 0x7ba   :  { %v1217_v17 = vsel %vm259_vm1, %v1216_v15, -inf }
 0x7bb   :  { %1218 = vmax.xlane.f32.xlu0 %v1217_v17 }
 0x7bd   :  { %v1372_v18 = vpop.f32.mrf.mxu3 }
 0x7be   :  { %v1375_v20 = vmul.f32 0.35355338, %v1372_v18 }
 0x7c0   :  { %v1376_v21 = vadd.f32 %v2136_v1, %v1375_v20 }
 0x7c2   :  { %v1377_v22 = vsel %vm259_vm1, %v1376_v21, -inf }
 0x7c3   :  { %1378 = vmax.xlane.f32.xlu1 %v1377_v22 }
 0x7cd   :  { %v1292_v23 = vpop.f32.mrf.mxu2 }
 0x7ce   :  { %v1139_v24 = vpop.xlane.xlu1 %1138  ;;  %v1295_v25 = vmul.f32 0.35355338, %v1292_v23 }
 0x7cf   :  { %v1140_v26 = vsub.f32 %v1136_v5, %v1139_v24 }
 0x7d0   :  { %v1296_v13 = vadd.f32 %v2136_v1, %v1295_v25 }
 0x7d1   :  { %v1141_v27 = vmul.f32 1.442695, %v1140_v26 }
 0x7d2   :  { %v1297_v29 = vsel %vm259_vm1, %v1296_v13, -inf }
 0x7d3   :  { %2183 = vpow2.f32 %v1141_v27  ;;  %1298 = vmax.xlane.f32.xlu2 %v1297_v29 }
 0x7d5   :  { %v1467_v31 = vpop.f32.mrf.mxu2 }
 0x7d6   :  { %v1470_v32 = vmul.f32 0.35355338, %v1467_v31 }
 0x7d8   :  { %v1474_v35 = vadd.f32 %v2137_v30, %v1470_v32 }
 0x7d9   :  { %v2964_v28 = vpop.eup %2183 }
 0x7da   :  { %v1475_v36 = vsel %vm259_vm1, %v1474_v35, -inf  ;;  %v1143_v34 = vsel %vm259_vm1, %v2964_v28, 0.0 }
 0x7db   :  { %1476 = vmax.xlane.f32.xlu0 %v1475_v36  ;;  %1144 = vadd.xlane.f32.xlu2 %v1143_v34 }
 0x7fd   :  { %v1550_v37 = vpop.f32.mrf.mxu3 }
 0x7fe   :  { %v1553_v38 = vmul.f32 0.35355338, %v1550_v37 }
 0x800   :  { %v2969_v40 = vadd.f32 %v2137_v30, %v1553_v38 }
 0x802   :  { %v1555_v41 = vsel %vm259_vm1, %v2969_v40, -inf }
 0x803   :  { %1556 = vmax.xlane.f32.xlu2 %v1555_v41 }
 0x805   :  { %v1630_v42 = vpop.f32.mrf.mxu2  ;;  %v1710_v43 = vpop.f32.mrf.mxu3 }
 0x806   :  { %v1633_v44 = vmul.f32 0.35355338, %v1630_v42  ;;  %v1713_v45 = vmul.f32 0.35355338, %v1710_v43 }
 0x808   :  { %v2973_v46 = vadd.f32 %v2137_v30, %v1713_v45  ;;  %v2975_v33 = vadd.f32 %v2137_v30, %v1633_v44 }
 0x80a   :  { %v1715_v47 = vsel %vm259_vm1, %v2973_v46, -inf  ;;  %v1635_v48 = vsel %vm259_vm1, %v2975_v33, -inf }
 0x80b   :  { %1716 = vmax.xlane.f32.xlu0 %v1715_v47  ;;  %1636 = vmax.xlane.f32.xlu1 %v1635_v48 }
 0x81b   :  { %1161 = vrot.lane.b32.xlu2 %v2915_v39, %s2517_s20 }
 0x824   :  { %1241 = vrot.lane.b32.xlu1 %v2915_v39, %s2519_s5 }
 0x82e   :  { %v1219_v52 = vpop.xlane.xlu0 %1218 }
 0x82f   :  { %v1220_v16 = vsub.f32 %v1216_v15, %v1219_v52 }
 0x831   :  { %v1221_v54 = vmul.f32 1.442695, %v1220_v16 }
 0x836   :  { %v1379_v49 = vpop.xlane.xlu1 %1378 }
 0x837   :  { %v1380_v50 = vsub.f32 %v1376_v21, %v1379_v49 }
 0x839   :  { %v1381_v53 = vmul.f32 1.442695, %v1380_v50 }
 0x83b   :  { %2185 = vpow2.f32 %v1381_v53 }
 0x83c   :  { %2187 = vpow2.f32 %v1221_v54 }
 0x841   :  { %v2985_v56 = vpop.eup %2185 }
 0x842   :  { %v1383_v4 = vsel %vm259_vm1, %v2985_v56, 0.0  ;;  %v2989_v59 = vpop.eup %2187 }
 0x843   :  { %v1223_v61 = vsel %vm259_vm1, %v2989_v59, 0.0 }
 0x844   :  { %1384 = vadd.xlane.f32.xlu2 %v1383_v4 }
 0x846   :  { %v1299_v57 = vpop.xlane.xlu2 %1298 }
 0x847   :  { %v1300_v58 = vsub.f32 %v1296_v13, %v1299_v57 }
 0x849   :  { %v1301_v60 = vmul.f32 1.442695, %v1300_v58 }
 0x84b   :  { %2189 = vpow2.f32 %v1301_v60 }
 0x84e   :  { %1224 = vadd.xlane.f32.xlu1 %v1223_v61  ;;  %v1477_v62 = vpop.xlane.xlu0 %1476  ;;  %v1145_v3 = vpop.xlane.xlu2 %1144 }
 0x84f   :  { %v1478_v63 = vsub.f32 %v1474_v35, %v1477_v62  ;;  %v1157_v14 = vand.u32 2147483648, %v1145_v3  ;;  %vm1151_vm2 = vweird.f32 %v1145_v3  ;;  %v1155_v15 = vand.u32 2147483647, %v1145_v3 }
 0x851   :  { %v2993_v0 = vpop.eup %2189  ;;  %v1479_v1 = vmul.f32 1.442695, %v1478_v63  ;;  %v1158_v21 = vor.u32 1.1754944e-38, %v1157_v14  ;;  %vm1156_vm4 = vcmp.eq.f32.partialorder %v1155_v15, 8.507059e+37 }
 0x852   :  { %v1303_v2 = vsel %vm259_vm1, %v2993_v0, 0.0 }
 0x853   :  { %1304 = vadd.xlane.f32.xlu0 %v1303_v2  ;;  %2191 = vpow2.f32 %v1479_v1 }
 0x854   :  { %2193 = vrcp.f32 %v1145_v3 }
 0x859   :  { %v2997_v8 = vpop.eup %2191 }
 0x85a   :  { %v1481_v5 = vsel %vm259_vm1, %v2997_v8, 0.0  ;;  %v2194_v7 = vpop.eup %2193 }
 0x85b   :  { %1482 = vadd.xlane.f32.xlu1 %v1481_v5  ;;  %v1147_v9 = vmul.f32 %v2194_v7, %v1145_v3  ;;  %vm1152_vm15 = vweird.f32 %v2194_v7 }
 0x85c   :  { %1401 = vrot.lane.b32.xlu2 %v2915_v39, %s2521_s2  ;;  %vm1153_vm3 = vmor %vm1151_vm2, %vm1152_vm15 }
 0x85d   :  { %v1148_v10 = vsub.f32 1.0, %v1147_v9 }
 0x85f   :  { %v1149_v11 = vmul.f32 %v2194_v7, %v1148_v10 }
 0x861   :  { %v1150_v12 = vadd.f32 %v2194_v7, %v1149_v11 }
 0x863   :  { %v1154_v20 = vsel %vm1153_vm3, %v2194_v7, %v1150_v12 }
 0x864   :  { %1579 = vrot.lane.b32.xlu2 %v2933_v55, %s2519_s5  ;;  %v1159_v23 = vsel %vm1156_vm4, %v1158_v21, %v1154_v20  ;;  %s3188_s5 = sld [smem:[#allocation32_spill]] }
 0x865   :  { %v1160_v26 = vmul.f32 %v2964_v28, %v1159_v23 }
 0x86c   :  { %1739 = vrot.lane.b32.xlu2 %v2933_v55, %s2521_s2  ;;  %s2022_s2 = sshll.u32 %s3188_s5, 4  ;;  %s2023_s2 = int_to_ptr.hbm [resolvable:$true] %s2022_s2 }
 0x874   :  { %1499 = vrot.lane.b32.xlu1 %v2933_v55, %s2517_s20  ;;  %s2020_s20 = sshll.u32 %s2528_s4, 4  ;;  %s2021_s20 = int_to_ptr.vmem [resolvable:$true] %s2020_s20 }
 0x876   :  { %v1557_v17 = vpop.xlane.xlu2 %1556 }
 0x877   :  { %v1558_v18 = vsub.f32 %v2969_v40, %v1557_v17 }
 0x879   :  { %v1559_v22 = vmul.f32 1.442695, %v1558_v18 }
 0x87b   :  { %2195 = vpow2.f32 %v1559_v22 }
 0x87c   :  { %1659 = vrot.lane.b32.xlu1 %v2933_v55, %s2518_s7 }
 0x87e   :  { %v1162_v24 = vpop.permute.xlu2 %1161  ;;  %v1637_v25 = vpop.xlane.xlu1 %1636 }
 0x87f   :  { %v1638_v13 = vsub.f32 %v2975_v33, %v1637_v25  ;;  %v1717_v27 = vpop.xlane.xlu0 %1716  ;;  %1182 = vmatpush.msra.mxu1 %v1162_v24 }
 0x880   :  { %2074 = vmatmul.msk.f32.vlgmr.msra.gmra.mxu1 %vm259_vm1, %v1160_v26  ;;  %v1718_v31 = vsub.f32 %v2973_v46, %v1717_v27 }
 0x881   :  { %v3015_v29 = vpop.eup %2195  ;;  %v1639_v30 = vmul.f32 1.442695, %v1638_v13 }
 0x882   :  { %v1561_v32 = vsel %vm259_vm1, %v3015_v29, 0.0  ;;  %v1719_v55 = vmul.f32 1.442695, %v1718_v31 }
 0x883   :  { %2197 = vpow2.f32 %v1639_v30  ;;  %1562 = vadd.xlane.f32.xlu0 %v1561_v32 }
 0x884   :  { %2199 = vpow2.f32 %v1719_v55 }
 0x889   :  { %v3020_v35 = vpop.eup %2197 }
 0x88a   :  { %v1641_v28 = vsel %vm259_vm1, %v3020_v35, 0.0  ;;  %v3024_v36 = vpop.eup %2199 }
 0x88b   :  { %1642 = vadd.xlane.f32.xlu0 %v1641_v28  ;;  %v1721_v34 = vsel %vm259_vm1, %v3024_v36, 0.0 }
 0x893   :  { %1722 = vadd.xlane.f32.xlu0 %v1721_v34 }
 0x896   :  { %v1242_v37 = vpop.permute.xlu1 %1241 }
 0x897   :  { %1262 = vmatpush.msrb.mxu0 %v1242_v37 }
 0x8a7   :  { %1321 = vrot.lane.b32.xlu0 %v2915_v39, %s2518_s7 }
 0x8b7   :  { %v1385_v38 = vpop.xlane.xlu2 %1384 }
 0x8b8   :  { %2201 = vrcp.f32 %v1385_v38  ;;  %v1397_v54 = vand.u32 2147483648, %v1385_v38  ;;  %vm1391_vm12 = vweird.f32 %v1385_v38  ;;  %v1395_v57 = vand.u32 2147483647, %v1385_v38 }
 0x8ba   :  { %v1398_v62 = vor.u32 1.1754944e-38, %v1397_v54  ;;  %vm1396_vm14 = vcmp.eq.f32.partialorder %v1395_v57, 8.507059e+37 }
 0x8be   :  { %v2202_v42 = vpop.eup %2201 }
 0x8bf   :  { %v1402_v40 = vpop.permute.xlu2 %1401  ;;  %v1387_v43 = vmul.f32 %v2202_v42, %v1385_v38  ;;  %vm1392_vm10 = vweird.f32 %v2202_v42 }
 0x8c0   :  { %1422 = vmatpush.msra.mxu0 %v1402_v40  ;;  %vm1393_vm13 = vmor %vm1391_vm12, %vm1392_vm10 }
 0x8c1   :  { %v1225_v41 = vpop.xlane.xlu1 %1224  ;;  %v1388_v45 = vsub.f32 1.0, %v1387_v43 }
 0x8c2   :  { %2203 = vrcp.f32 %v1225_v41  ;;  %v1237_v47 = vand.u32 2147483648, %v1225_v41  ;;  %v1235_v50 = vand.u32 2147483647, %v1225_v41  ;;  %vm1231_vm8 = vweird.f32 %v1225_v41 }
 0x8c3   :  { %v1389_v48 = vmul.f32 %v2202_v42, %v1388_v45 }
 0x8c4   :  { %v1238_v39 = vor.u32 1.1754944e-38, %v1237_v47  ;;  %vm1236_vm11 = vcmp.eq.f32.partialorder %v1235_v50, 8.507059e+37 }
 0x8c5   :  { %v1390_v53 = vadd.f32 %v2202_v42, %v1389_v48 }
 0x8c6   :  { %v1305_v3 = vpop.xlane.xlu0 %1304 }
 0x8c7   :  { %v1580_v58 = vpop.permute.xlu2 %1579  ;;  %v1394_v61 = vsel %vm1393_vm13, %v2202_v42, %v1390_v53  ;;  %v1317_v34 = vand.u32 2147483648, %v1305_v3  ;;  %v1315_v38 = vand.u32 2147483647, %v1305_v3 }
 0x8c8   :  { %v2204_v44 = vpop.eup %2203  ;;  %v1399_v63 = vsel %vm1396_vm14, %v1398_v62, %v1394_v61 }
 0x8c9   :  { %v1227_v46 = vmul.f32 %v2204_v44, %v1225_v41  ;;  %vm1232_vm5 = vweird.f32 %v2204_v44  ;;  %v1400_v1 = vmul.f32 %v2985_v56, %v1399_v63  ;;  %vm1316_vm12 = vcmp.eq.f32.partialorder %v1315_v38, 8.507059e+37 }
 0x8ca   :  { %vm1233_vm9 = vmor %vm1231_vm8, %vm1232_vm5  ;;  %vm1311_vm8 = vweird.f32 %v1305_v3 }
 0x8cb   :  { %v1228_v33 = vsub.f32 1.0, %v1227_v46  ;;  %v1318_v46 = vor.u32 1.1754944e-38, %v1317_v34 }
 0x8cd   :  { %v1229_v49 = vmul.f32 %v2204_v44, %v1228_v33 }
 0x8ce   :  { %v3036_v10 = vpop.xlane.xlu1 %1482 }
 0x8cf   :  { %v1230_v52 = vadd.f32 %v2204_v44, %v1229_v49  ;;  %v1740_v2 = vpop.permute.xlu2 %1739  ;;  %v1495_v53 = vand.u32 2147483648, %v3036_v10  ;;  %v1493_v54 = vand.u32 2147483647, %v3036_v10 }
 0x8d1   :  { %v1234_v16 = vsel %vm1233_vm9, %v2204_v44, %v1230_v52  ;;  %v1496_v61 = vor.u32 1.1754944e-38, %v1495_v53 }
 0x8d2   :  { %v1239_v4 = vsel %vm1236_vm11, %v1238_v39, %v1234_v16 }
 0x8d3   :  { %v1240_v60 = vmul.f32 %v2989_v59, %v1239_v4 }
 0x8d5   :  { %2077 = vmatmul.msk.f32.vlgmr.msrb.gmra.mxu0 %vm259_vm1, %v1240_v60 }
 0x8d6   :  { %1600 = vmatpush.msrb.mxu0 %v1580_v58 }
 0x8dd   :  { %2083 = vmatmul.msk.f32.vlgmr.msra.gmra.mxu0 %vm259_vm1, %v1400_v1 }
 0x8de   :  { %1760 = vmatpush.msra.mxu0 %v1740_v2 }
 0x8f6   :  { %v1563_v5 = vpop.xlane.xlu0 %1562 }
 0x8f7   :  { %2205 = vrcp.f32 %v1563_v5  ;;  %v1575_v14 = vand.u32 2147483648, %v1563_v5  ;;  %v1573_v15 = vand.u32 2147483647, %v1563_v5  ;;  %vm1569_vm2 = vweird.f32 %v1563_v5 }
 0x8f8   :  { %2207 = vrcp.f32 %v1305_v3 }
 0x8f9   :  { %2209 = vrcp.f32 %v3036_v10  ;;  %v1576_v20 = vor.u32 1.1754944e-38, %v1575_v14  ;;  %vm1574_vm4 = vcmp.eq.f32.partialorder %v1573_v15, 8.507059e+37  ;;  %v1783_v15 = vld [vmem:[#allocation16 + $0x18] sm:$0xff] }
 0x8fa   :  { %1806 = vmatpush.msrb.mxu2 %v1783_v15 }
 0x8fd   :  { %v2206_v7 = vpop.eup %2205 }
 0x8fe   :  { %v1565_v59 = vmul.f32 %v2206_v7, %v1563_v5  ;;  %v3034_v9 = vpop.xlane.xlu0 %1642  ;;  %v2208_v11 = vpop.eup %2207  ;;  %vm1570_vm15 = vweird.f32 %v2206_v7 }
 0x8ff   :  { %v1307_v17 = vmul.f32 %v2208_v11, %v1305_v3  ;;  %vm1571_vm3 = vmor %vm1569_vm2, %vm1570_vm15  ;;  %v2210_v25 = vpop.eup %2209  ;;  %vm1312_vm5 = vweird.f32 %v2208_v11  ;;  %vm1489_vm2 = vweird.f32 %v3036_v10  ;;  %v1655_v1 = vand.u32 2147483648, %v3034_v9 }
 0x900   :  { %v1566_v12 = vsub.f32 1.0, %v1565_v59  ;;  %v1485_v27 = vmul.f32 %v2210_v25, %v3036_v10  ;;  %vm1313_vm9 = vmor %vm1311_vm8, %vm1312_vm5  ;;  %vm1490_vm15 = vweird.f32 %v2210_v25  ;;  %vm1649_vm8 = vweird.f32 %v3034_v9 }
 0x901   :  { %v1308_v23 = vsub.f32 1.0, %v1307_v17  ;;  %v1656_v5 = vor.u32 1.1754944e-38, %v1655_v1  ;;  %v1782_v17 = vld [vmem:[#allocation16 + $0x10] sm:$0xff] }
 0x902   :  { %v1567_v56 = vmul.f32 %v2206_v7, %v1566_v12  ;;  %v1486_v55 = vsub.f32 1.0, %v1485_v27  ;;  %1807 = vmatpush.msrb.mxu2 %v1782_v17 }
 0x903   :  { %v1309_v13 = vmul.f32 %v2208_v11, %v1308_v23 }
 0x904   :  { %v1568_v18 = vadd.f32 %v2206_v7, %v1567_v56  ;;  %v1487_v44 = vmul.f32 %v2210_v25, %v1486_v55 }
 0x905   :  { %v1310_v32 = vadd.f32 %v2208_v11, %v1309_v13 }
 0x906   :  { %v1572_v21 = vsel %vm1571_vm3, %v2206_v7, %v1568_v18  ;;  %v1723_v22 = vpop.xlane.xlu0 %1722  ;;  %v1488_v50 = vadd.f32 %v2210_v25, %v1487_v44  ;;  %vm1491_vm3 = vmor %vm1489_vm2, %vm1490_vm15  ;;  %v1781_v18 = vld [vmem:[#allocation16 + $0x8] sm:$0xff] }
 0x907   :  { %v1577_v24 = vsel %vm1574_vm4, %v1576_v20, %v1572_v21  ;;  %2211 = vrcp.f32 %v1723_v22  ;;  %v1735_v40 = vand.u32 2147483648, %v1723_v22  ;;  %v1733_v42 = vand.u32 2147483647, %v1723_v22  ;;  %1808 = vmatpush.msrb.mxu2 %v1781_v18  ;;  %v1780_v20 = vld [vmem:[#allocation16] sm:$0xff] }
 0x908   :  { %v1578_v26 = vmul.f32 %v3015_v29, %v1577_v24  ;;  %2213 = vrcp.f32 %v3034_v9  ;;  %v1500_v29 = vpop.permute.xlu1 %1499  ;;  %v1314_v43 = vsel %vm1313_vm9, %v2208_v11, %v1310_v32  ;;  %vm1729_vm11 = vweird.f32 %v1723_v22 }
 0x909   :  { %v1736_v47 = vor.u32 1.1754944e-38, %v1735_v40  ;;  %v1319_v48 = vsel %vm1316_vm12, %v1318_v46, %v1314_v43  ;;  %vm1734_vm14 = vcmp.eq.f32.partialorder %v1733_v42, 8.507059e+37  ;;  %v1492_v58 = vsel %vm1491_vm3, %v2210_v25, %v1488_v50  ;;  %1809 = vmatpush.msrb.mxu2 %v1780_v20 }
 0x90a   :  { %2089 = vmatmul.msk.f32.vlgmr.msrb.gmra.mxu0 %vm259_vm1, %v1578_v26  ;;  %v1320_v57 = vmul.f32 %v2993_v0, %v1319_v48  ;;  %vm1494_vm4 = vcmp.eq.f32.partialorder %v1493_v54, 8.507059e+37  ;;  %v1653_v0 = vand.u32 2147483647, %v3034_v9 }
 0x90d   :  { %v2212_v30 = vpop.eup %2211 }
 0x90e   :  { %v1725_v31 = vmul.f32 %v2212_v30, %v1723_v22  ;;  %v2214_v28 = vpop.eup %2213  ;;  %vm1730_vm10 = vweird.f32 %v2212_v30 }
 0x90f   :  { %v1645_v45 = vmul.f32 %v2214_v28, %v3034_v9  ;;  %vm1731_vm13 = vmor %vm1729_vm11, %vm1730_vm10  ;;  %vm1650_vm5 = vweird.f32 %v2214_v28  ;;  %vm1654_vm10 = vcmp.eq.f32.partialorder %v1653_v0, 8.507059e+37 }
 0x910   :  { %v1726_v37 = vsub.f32 1.0, %v1725_v31  ;;  %v1660_v62 = vpop.permute.xlu1 %1659  ;;  %vm1651_vm9 = vmor %vm1649_vm8, %vm1650_vm5 }
 0x911   :  { %v1646_v52 = vsub.f32 1.0, %v1645_v45 }
 0x912   :  { %v1727_v41 = vmul.f32 %v2212_v30, %v1726_v37 }
 0x913   :  { %v1647_v60 = vmul.f32 %v2214_v28, %v1646_v52  ;;  %v1875_v52 = vld [vmem:[#allocation17] sm:$0xff] }
 0x914   :  { %v1728_v33 = vadd.f32 %v2212_v30, %v1727_v41 }
 0x915   :  { %v1648_v63 = vadd.f32 %v2214_v28, %v1647_v60 }
 0x916   :  { %v1732_v49 = vsel %vm1731_vm13, %v2212_v30, %v1728_v33  ;;  %v1878_v33 = vld [vmem:[#allocation17 + $0x18] sm:$0xff] }
 0x917   :  { %v1737_v39 = vsel %vm1734_vm14, %v1736_v47, %v1732_v49  ;;  %v1652_v3 = vsel %vm1651_vm9, %v2214_v28, %v1648_v63  ;;  %v2138_v28 = vld [vmem:[%s3164_s13] ss:$0 sm:$0xff]  ;;  %v1877_v47 = vld [vmem:[#allocation17 + $0x10] sm:$0xff]  ;;  %vm1926_vm14 = vcmask 523264  }
 0x918   :  { %v1738_v16 = vmul.f32 %v3024_v36, %v1737_v39  ;;  %v1497_v36 = vsel %vm1494_vm4, %v1496_v61, %v1492_v58  ;;  %v1657_v7 = vsel %vm1654_vm10, %v1656_v5, %v1652_v3  ;;  %v1876_v49 = vld [vmem:[#allocation17 + $0x8] sm:$0xff]  ;;  %v1921_v61 = vld [vmem:[%s3168_s17 + $0x38] sm:$0xff] }
 0x919   :  { %v1322_v4 = vpop.permute.xlu0 %1321  ;;  %v1498_v2 = vmul.f32 %v2997_v8, %v1497_v36  ;;  %v1658_v59 = vmul.f32 %v3020_v35, %v1657_v7  ;;  %v1184_v8 = vpop.f32.mrf.mxu1  ;;  %1941 = vmatpush.msra.mxu3 %v1921_v61  ;;  %v1918_v7 = vld [vmem:[%s3168_s17 + $0x20] sm:$0xff] }
 0x91a   :  { %1342 = vmatpush.msrb.mxu1 %v1322_v4  ;;  %2095 = vmatmul.msk.f32.vlgmr.msra.gmra.mxu0 %vm259_vm1, %v1738_v16 }
 0x91b   :  { %2080 = vmatmul.msk.f32.vlgmr.msrb.gmra.mxu1 %vm259_vm1, %v1320_v57 }
 0x91c   :  { %1520 = vmatpush.msra.mxu1 %v1500_v29 }
 0x91e   :  { %1680 = vmatpush.msrb.mxu1 %v1660_v62  ;;  %v1920_v62 = vld [vmem:[%s3168_s17 + $0x30] sm:$0xff] }
 0x91f   :  { %1942 = vmatpush.msra.mxu3 %v1920_v62 }
 0x923   :  { %2086 = vmatmul.msk.f32.vlgmr.msra.gmra.mxu1 %vm259_vm1, %v1498_v2  ;;  %v1919_v2 = vld [vmem:[%s3168_s17 + $0x28] sm:$0xff] }
 0x924   :  { %1901 = vmatpush.msra.mxu1 %v1878_v33  ;;  %1943 = vmatpush.msra.mxu3 %v1919_v2 }
 0x926   :  { %1902 = vmatpush.msra.mxu1 %v1877_v47  ;;  %1944 = vmatpush.msra.mxu3 %v1918_v7 }
 0x928   :  { %1903 = vmatpush.msra.mxu1 %v1876_v49 }
 0x92a   :  { %1904 = vmatpush.msra.mxu1 %v1875_v52 }
 0x92b   :  { %2092 = vmatmul.msk.f32.vlgmr.msrb.gmra.mxu1 %vm259_vm1, %v1658_v59 }
 0x952   :  { %v1264_v10 = vpop.f32.mrf.mxu0 }
 0x953   :  { %1428 = vrot.lane.b32.xlu0 %v1264_v10, %s3185_s11 }
 0x95a   :  { %v1424_v11 = vpop.f32.mrf.mxu0 }
 0x95b   :  { %1436 = vrot.lane.b32.xlu2 %v1424_v11, %s2526_s22  ;;  %v1917_v11 = vld [vmem:[%s3168_s17 + $0x18] sm:$0xff] }
 0x95c   :  { %1945 = vmatpush.msra.mxu3 %v1917_v11 }
 0x987   :  { %v1602_v9 = vpop.f32.mrf.mxu0 }
 0x988   :  { %1766 = vrot.lane.b32.xlu0 %v1602_v9, %s3185_s11 }
 0x997   :  { %v1762_v12 = vpop.f32.mrf.mxu0 }
 0x998   :  { %1774 = vrot.lane.b32.xlu2 %v1762_v12, %s2526_s22  ;;  %v1344_v14 = vpop.f32.mrf.mxu1  ;;  %v2139_v12 = vld [vmem:[%s3165_s14 + $0x2] ss:$0 sm:$0xff] }
 0x999   :  { %1432 = vrot.lane.b32.xlu1 %v1344_v14, %s2505_s29 }
 0x9a0   :  { %v1522_v56 = vpop.f32.mrf.mxu1 }
 0x9a8   :  { %v1682_v35 = vpop.f32.mrf.mxu1 }
 0x9a9   :  { %1770 = vrot.lane.b32.xlu1 %v1682_v35, %s2505_s29  ;;  %v2140_v35 = vld [vmem:[%s3165_s14 + $0x3] ss:$0 sm:$0xff]  ;;  %s3187_s29 = sld [smem:[#allocation31_spill]] }
 0x9b5   :  { %v1437_v24 = vpop.permute.xlu2 %1436 }
 0x9c5   :  { %v1429_v21 = vpop.permute.xlu0 %1428 }
 0x9c6   :  { %v1439_v22 = vsel %vm259_vm1, %v1184_v8, %v1429_v21 }
 0x9f2   :  { %v1775_v31 = vpop.permute.xlu2 %1774 }
 0x9fa   :  { %v1767_v13 = vpop.permute.xlu0 %1766 }
 0x9fb   :  { %v1777_v27 = vsel %vm259_vm1, %v1522_v56, %v1767_v13 }
 0xa0b   :  { %v1433_v23 = vpop.permute.xlu1 %1432 }
 0xa0c   :  { %v1440_v25 = vsel %vm589_vm6, %v1439_v22, %v1433_v23 }
 0xa0d   :  { %v1441_v26 = vsel %vm591_vm7, %v1440_v25, %v1437_v24 }
 0xa0e   :  { %2096 = vmatmul.msk.f32.vlgmr.msrb.gmra.mxu2 %vm225_vm0, %v1441_v26 }
 0xa1b   :  { %v1771_v30 = vpop.permute.xlu1 %1770 }
 0xa1c   :  { %v1778_v32 = vsel %vm589_vm6, %v1777_v27, %v1771_v30 }
 0xa1d   :  { %v1779_v55 = vsel %vm591_vm7, %v1778_v32, %v1775_v31  ;;  %v1916_v31 = vld [vmem:[%s3168_s17 + $0x10] sm:$0xff]  ;;  %v1915_v32 = vld [vmem:[%s3168_s17 + $0x8] sm:$0xff] }
 0xa1e   :  { %2097 = vmatmul.msk.f32.gmra.mxu2 %vm225_vm0, %v1779_v55  ;;  %1946 = vmatpush.msra.mxu3 %v1916_v31  ;;  %v1914_v55 = vld [vmem:[%s3168_s17] sm:$0xff] }
 0xa20   :  { %1947 = vmatpush.msra.mxu3 %v1915_v32 }
 0xa22   :  { %1948 = vmatpush.msra.mxu3 %v1914_v55 }
 0xa91   :  { %v1811_v34 = vpop.f32.mrf.mxu2 }
 0xa92   :  { %v1812_v37 = vadd.f32 %v2138_v28, %v1811_v34 }
 0xa94   :  { %v1817_v38 = vadd.f32 %v1812_v37, %v2908_v19 }
 0xa96   :  { %v1821_v40 = vsel %vm225_vm0, %v1817_v38, 0.0  ;;  %v1829_v29 = vmul.f32 %v1817_v38, %v1817_v38 }
 0xa97   :  { %1822 = vadd.xlane.f32.xlu0 %v1821_v40 }
 0xa98   :  { %v1831_v41 = vsel %vm225_vm0, %v1829_v29, 0.0 }
 0xa99   :  { %1832 = vadd.xlane.f32.xlu1 %v1831_v41 }
 0xaa1   :  { %v1814_v42 = vpop.f32.mrf.mxu2 }
 0xaa2   :  { %v1815_v43 = vadd.f32 %v2138_v28, %v1814_v42  ;;  %v2141_v28 = vld [vmem:[%s3167_s16] ss:$0 sm:$0xff] }
 0xaa3   :  { %v2142_v42 = vld [vmem:[%s3187_s29] ss:$0 sm:$0xff] }
 0xaa4   :  { %v3079_v44 = vadd.f32 %v1815_v43, %v2926_v51 }
 0xaa6   :  { %v1824_v45 = vsel %vm225_vm0, %v3079_v44, 0.0  ;;  %v1830_v46 = vmul.f32 %v3079_v44, %v3079_v44 }
 0xaa7   :  { %1825 = vadd.xlane.f32.xlu2 %v1824_v45 }
 0xaa8   :  { %v1834_v19 = vsel %vm225_vm0, %v1830_v46, 0.0 }
 0xaa9   :  { %1835 = vadd.xlane.f32.xlu0 %v1834_v19 }
 0xb0a   :  { %v1823_v48 = vpop.xlane.xlu0 %1822 }
 0xb0b   :  { %v1827_v50 = vmul.f32 %v1823_v48, %v2895_v6 }
 0xb0c   :  { %v1833_v51 = vpop.xlane.xlu1 %1832 }
 0xb0d   :  { %v1839_v39 = vmul.f32 %v1827_v50, %v1827_v50  ;;  %v1837_v53 = vmul.f32 %v1833_v51, %v2895_v6  ;;  %v1843_v8 = vsub.f32 %v1817_v38, %v1827_v50 }
 0xb0f   :  { %v1841_v16 = vsub.f32 %v1837_v53, %v1839_v39 }
 0xb11   :  { %v1845_v54 = vadd.f32 1e-05, %v1841_v16 }
 0xb13   :  { %2215 = vrsqrt.f32 %v1845_v54  ;;  %vm1853_vm6 = vweird.f32 %v1845_v54 }
 0xb19   :  { %v2216_v4 = vpop.eup %2215 }
 0xb1a   :  { %v1848_v57 = vmul.f32 %v2216_v4, %v1845_v54  ;;  %v1826_v58 = vpop.xlane.xlu2 %1825  ;;  %vm1854_vm1 = vweird.f32 %v2216_v4 }
 0xb1b   :  { %v1828_v60 = vmul.f32 %v1826_v58, %v2895_v6  ;;  %vm1855_vm7 = vmor %vm1853_vm6, %vm1854_vm1 }
 0xb1c   :  { %v1849_v36 = vmul.f32 %v2216_v4, %v1848_v57  ;;  %v1836_v63 = vpop.xlane.xlu0 %1835 }
 0xb1d   :  { %v1840_v1 = vmul.f32 %v1828_v60, %v1828_v60  ;;  %v1838_v0 = vmul.f32 %v1836_v63, %v2895_v6  ;;  %v1844_v25 = vsub.f32 %v3079_v44, %v1828_v60 }
 0xb1e   :  { %v1850_v3 = vmul.f32 0.5, %v1849_v36 }
 0xb1f   :  { %v1842_v5 = vsub.f32 %v1838_v0, %v1840_v1 }
 0xb20   :  { %v1851_v59 = vsub.f32 1.5, %v1850_v3 }
 0xb21   :  { %v1846_v10 = vadd.f32 1e-05, %v1842_v5 }
 0xb22   :  { %v1852_v9 = vmul.f32 %v2216_v4, %v1851_v59 }
 0xb23   :  { %2217 = vrsqrt.f32 %v1846_v10  ;;  %vm1863_vm12 = vweird.f32 %v1846_v10 }
 0xb24   :  { %v1856_v14 = vsel %vm1855_vm7, %v2216_v4, %v1852_v9  ;;  %v2143_v9 = vld [vmem:[%s3165_s14 + $0x4] ss:$0 sm:$0xff] }
 0xb25   :  { %v1867_v56 = vmul.f32 %v1856_v14, %v1843_v8 }
 0xb27   :  { %v1870_v15 = vmul.f32 %v2139_v12, %v1867_v56 }
 0xb29   :  { %v2218_v17 = vpop.eup %2217  ;;  %v1873_v18 = vadd.f32 %v2140_v35, %v1870_v15 }
 0xb2a   :  { %v1858_v20 = vmul.f32 %v2218_v17, %v1846_v10  ;;  %vm1864_vm11 = vweird.f32 %v2218_v17 }
 0xb2b   :  { %2098 = vmatmul.msk.f32.vlgmr.msra.gmra.mxu1 %vm225_vm0, %v1873_v18  ;;  %vm1865_vm13 = vmor %vm1863_vm12, %vm1864_vm11 }
 0xb2c   :  { %v1859_v21 = vmul.f32 %v2218_v17, %v1858_v20 }
 0xb2e   :  { %v1860_v22 = vmul.f32 0.5, %v1859_v21 }
 0xb30   :  { %v1861_v23 = vsub.f32 1.5, %v1860_v22 }
 0xb32   :  { %v1862_v24 = vmul.f32 %v2218_v17, %v1861_v23 }
 0xb34   :  { %v1866_v26 = vsel %vm1865_vm13, %v2218_v17, %v1862_v24 }
 0xb35   :  { %v1868_v13 = vmul.f32 %v1866_v26, %v1844_v25 }
 0xb37   :  { %v1871_v27 = vmul.f32 %v2139_v12, %v1868_v13 }
 0xb39   :  { %v1874_v30 = vadd.f32 %v2140_v35, %v1871_v27 }
 0xb3b   :  { %2099 = vmatmul.msk.f32.gmra.mxu1 %vm225_vm0, %v1874_v30 }
 0xba8   :  { %v1906_v34 = vpop.f32.mrf.mxu1 }
 0xba9   :  { %v1907_v37 = vadd.f32 %v2141_v28, %v1906_v34 }
 0xbab   :  { %v1912_v38 = vmax.f32 %v1907_v37, 0.0 }
 0xbad   :  { %2100 = vmatmul.msk.f32.vlgmr.msra.gmra.mxu3 %vm1926_vm14, %v1912_v38 }
 0xbb8   :  { %v1909_v40 = vpop.f32.mrf.mxu1 }
 0xbb9   :  { %v1910_v29 = vadd.f32 %v2141_v28, %v1909_v40 }
 0xbbb   :  { %v1913_v41 = vmax.f32 %v1910_v29, 0.0 }
 0xbbd   :  { %2101 = vmatmul.msk.f32.gmra.mxu3 %vm1926_vm14, %v1913_v41 }
 0xc30   :  { %v1950_v43 = vpop.f32.mrf.mxu3 }
 0xc31   :  { %v1951_v44 = vadd.f32 %v2142_v42, %v1950_v43 }
 0xc33   :  { %v1956_v45 = vadd.f32 %v1951_v44, %v1873_v18 }
 0xc35   :  { %v1960_v46 = vsel %vm225_vm0, %v1956_v45, 0.0  ;;  %v1968_v19 = vmul.f32 %v1956_v45, %v1956_v45 }
 0xc36   :  { %1961 = vadd.xlane.f32.xlu2 %v1960_v46 }
 0xc37   :  { %v1970_v33 = vsel %vm225_vm0, %v1968_v19, 0.0 }
 0xc38   :  { %1971 = vadd.xlane.f32.xlu0 %v1970_v33 }
 0xc40   :  { %v1953_v47 = vpop.f32.mrf.mxu3 }
 0xc41   :  { %v1954_v48 = vadd.f32 %v2142_v42, %v1953_v47 }
 0xc43   :  { %v1957_v49 = vadd.f32 %v1954_v48, %v1874_v30 }
 0xc45   :  { %v1963_v50 = vsel %vm225_vm0, %v1957_v49, 0.0  ;;  %v1969_v51 = vmul.f32 %v1957_v49, %v1957_v49 }
 0xc46   :  { %1964 = vadd.xlane.f32.xlu1 %v1963_v50 }
 0xc47   :  { %v1973_v52 = vsel %vm225_vm0, %v1969_v51, 0.0 }
 0xc48   :  { %1974 = vadd.xlane.f32.xlu2 %v1973_v52 }
 0xca9   :  { %v1962_v39 = vpop.xlane.xlu2 %1961 }
 0xcaa   :  { %v1966_v53 = vmul.f32 %v1962_v39, %v2895_v6 }
 0xcab   :  { %v1972_v16 = vpop.xlane.xlu0 %1971 }
 0xcac   :  { %v1978_v54 = vmul.f32 %v1966_v53, %v1966_v53  ;;  %v1976_v4 = vmul.f32 %v1972_v16, %v2895_v6  ;;  %v1982_v11 = vsub.f32 %v1956_v45, %v1966_v53 }
 0xcae   :  { %v1980_v57 = vsub.f32 %v1976_v4, %v1978_v54 }
 0xcb0   :  { %v1984_v58 = vadd.f32 1e-05, %v1980_v57 }
 0xcb2   :  { %2219 = vrsqrt.f32 %v1984_v58  ;;  %vm1992_vm2 = vweird.f32 %v1984_v58 }
 0xcb8   :  { %v2220_v60 = vpop.eup %2219 }
 0xcb9   :  { %v1987_v61 = vmul.f32 %v2220_v60, %v1984_v58  ;;  %v1965_v62 = vpop.xlane.xlu1 %1964  ;;  %vm1993_vm15 = vweird.f32 %v2220_v60 }
 0xcba   :  { %v1967_v36 = vmul.f32 %v1965_v62, %v2895_v6  ;;  %vm1994_vm3 = vmor %vm1992_vm2, %vm1993_vm15 }
 0xcbb   :  { %v1988_v63 = vmul.f32 %v2220_v60, %v1987_v61  ;;  %v1975_v1 = vpop.xlane.xlu2 %1974 }
 0xcbc   :  { %v1979_v0 = vmul.f32 %v1967_v36, %v1967_v36  ;;  %v1977_v2 = vmul.f32 %v1975_v1, %v2895_v6  ;;  %v2144_v6 = vld [vmem:[%s3165_s14 + $0x5] ss:$0 sm:$0xff]  ;;  %v1983_v22 = vsub.f32 %v1957_v49, %v1967_v36 }
 0xcbd   :  { %v1989_v3 = vmul.f32 0.5, %v1988_v63 }
 0xcbe   :  { %v1981_v5 = vsub.f32 %v1977_v2, %v1979_v0 }
 0xcbf   :  { %v1990_v7 = vsub.f32 1.5, %v1989_v3 }
 0xcc0   :  { %v1985_v59 = vadd.f32 1e-05, %v1981_v5 }
 0xcc1   :  { %v1991_v10 = vmul.f32 %v2220_v60, %v1990_v7 }
 0xcc2   :  { %2221 = vrsqrt.f32 %v1985_v59  ;;  %vm2002_vm5 = vweird.f32 %v1985_v59 }
 0xcc3   :  { %v1995_v8 = vsel %vm1994_vm3, %v2220_v60, %v1991_v10 }
 0xcc4   :  { %v2006_v12 = vmul.f32 %v1995_v8, %v1982_v11 }
 0xcc6   :  { %v2009_v14 = vmul.f32 %v2143_v9, %v2006_v12 }
 0xcc8   :  { %v2222_v56 = vpop.eup %2221  ;;  %v2012_v35 = vadd.f32 %v2144_v6, %v2009_v14 }
 0xcc9   :  { %v1997_v15 = vmul.f32 %v2222_v56, %v1985_v59  ;;  %vm2003_vm4 = vweird.f32 %v2222_v56 }
 0xcca   :  { %2014 = vst.msk [vmem:[#allocation19] sm:$0xff] %vm225_vm0, %v2012_v35  ;;  %vm2004_vm8 = vmor %vm2002_vm5, %vm2003_vm4 }
 0xccb   :  { %v1998_v17 = vmul.f32 %v2222_v56, %v1997_v15 }
 0xccd   :  { %v1999_v18 = vmul.f32 0.5, %v1998_v17 }
 0xccf   :  { %v2000_v20 = vsub.f32 1.5, %v1999_v18 }
 0xcd1   :  { %v2001_v21 = vmul.f32 %v2222_v56, %v2000_v20 }
 0xcd3   :  { %v2005_v23 = vsel %vm2004_vm8, %v2222_v56, %v2001_v21 }
 0xcd4   :  { %v2007_v24 = vmul.f32 %v2005_v23, %v1983_v22 }
 0xcd6   :  { %v2010_v25 = vmul.f32 %v2143_v9, %v2007_v24 }
 0xcd8   :  { %v2013_v26 = vadd.f32 %v2144_v6, %v2010_v25 }
 0xcda   :  { %2015 = vst.msk [vmem:[#allocation19 + $0x8] sm:$0xff] %vm225_vm0, %v2013_v26 }
 0xcdb   :  { %2028 = dma.vmem_to_hbm [thread:$0]  %s2021_s20, 256, %s2023_s2, [#allocation4], %s3186_s19, %s3186_s19, %s3185_s11  }
 0xcdc   :  { %2499 = dma.done.wait [#allocation4], 256  }
 0xcdd   :  { %2500 = vsyncadd [#allocation4], 4294967040 }
 0xcde   :  { %2033 = vsyncpa [#allocation3], 1 }
 0xcdf   :  { %2034 = vsyncpa [#allocation6], 1 }
 0xce0   :  { %2035 = vsyncpa [#allocation9], 1 }
 0xce1   :  { %2036 = vsyncpa [#allocation12], 1 }
 0xce2   :  { %2037 = vsyncpa [#allocation15], 1 }
 0xce3   :  { %2038 = vsyncpa [#allocation18], 1 }
 0xce4   :  { %2039 = vsyncpa [#allocation4], 1 }

</bundles_post_ra>
